<compile_context>
chip_gen: v5e
topology: v5e:2x2
jax: 0.10.0
libtpu: 0.0.40
codegen_flags: <defaults>
</compile_context>

<pallas_src>
import functools

import jax
import jax.numpy as jnp
from jax import lax
from jax.experimental import pallas as pl
from jax.experimental.pallas import tpu as pltpu


def _round_up(x, m):
    return (x + m - 1) // m * m


def _vmem_limit(nbytes, headroom=1.5, floor=8 << 20, cap=48 << 20):
    return int(min(max(int(nbytes * headroom), floor), cap))


# ----------------------------------------------------------------------------- #
# Kernel 1: LSTM recurrence over one time-chunk (grid axis = time-chunks).
# ----------------------------------------------------------------------------- #
def lstm_chunk_kernel(x_ref, w_ih_ref, w_hh_ref, b_ref, hs_ref,
                      xg_ref, h_ref, c_ref, *, t_chunk, bp):
    """Process one chunk of `t_chunk` timesteps.

    x_ref   : (t_chunk*Bp, E)    time-major embedded tokens for this chunk
    w_ih_ref: (E, 4*Hp)          input->gates (per-gate padded to Hp columns)
    w_hh_ref: (Hp, 4*Hp)         hidden->gates
    b_ref   : (1, 4*Hp)          b_ih + b_hh
    hs_ref  : (t_chunk*Bp, Hp)   output hidden states for this chunk
    xg_ref  : (t_chunk*Bp, 4*Hp) scratch: hoisted input projection
    h_ref   : (Bp, Hp)           persistent hidden carry (across grid steps)
    c_ref   : (Bp, Hp)           persistent cell carry
    """
    hp = h_ref.shape[-1]

    @pl.when(pl.program_id(0) == 0)
    def _init():
        h_ref[...] = jnp.zeros_like(h_ref)
        c_ref[...] = jnp.zeros_like(c_ref)

    # Hoisted input projection + bias: one large MXU matmul per chunk
    # (bias broadcast also hoisted out of the serial loop).
    xg_ref[...] = (
        jnp.dot(x_ref[...], w_ih_ref[...], preferred_element_type=jnp.float32)
        + b_ref[...])

    w_hh = w_hh_ref[...]

    def step(t, carry):
        h, c = carry
        row = pl.multiple_of(t * bp, bp)                       # sublane-aligned
        gates = (xg_ref[pl.ds(row, bp), :]
                 + jnp.dot(h.astype(w_hh.dtype), w_hh,
                           preferred_element_type=jnp.float32))  # (Bp, 4Hp)
        # PyTorch LSTM gate ordering: i, f, g, o.  Hp is a multiple of 128, so
        # each slice is a free lane-aligned vreg view.
        i_g = jax.nn.sigmoid(gates[:, 0 * hp:1 * hp])
        f_g = jax.nn.sigmoid(gates[:, 1 * hp:2 * hp])
        g_g = jnp.tanh(gates[:, 2 * hp:3 * hp])
        o_g = jax.nn.sigmoid(gates[:, 3 * hp:4 * hp])
        c_new = f_g * c + i_g * g_g
        h_new = o_g * jnp.tanh(c_new)
        hs_ref[pl.ds(row, bp), :] = h_new
        return h_new, c_new

    h_fin, c_fin = lax.fori_loop(0, t_chunk, step,
                                 (h_ref[...], c_ref[...]), unroll=True)
    h_ref[...] = h_fin
    c_ref[...] = c_fin


# ----------------------------------------------------------------------------- #
# Kernel 2: FC projection + log_softmax, embarrassingly parallel over row tiles.
# ----------------------------------------------------------------------------- #
def fc_logsoftmax_kernel(hs_ref, w_ref, b_ref, out_ref):
    logits = (jnp.dot(hs_ref[...].astype(w_ref.dtype), w_ref[...],
                      preferred_element_type=jnp.float32)
              + b_ref[...])                                    # (rows, Vp)
    m = jnp.max(logits, axis=-1, keepdims=True)
    shifted = logits - m
    lse = jnp.log(jnp.sum(jnp.exp(shifted), axis=-1, keepdims=True))
    out_ref[...] = shifted - lse


# ----------------------------------------------------------------------------- #
# Wrapper
# ----------------------------------------------------------------------------- #
def rnn_model_forward(tokens, params, *, param_dtype=jnp.float32, t_chunk=8):
    """tokens: (B, T) int32.  Returns (B, T, V) float32 log-probabilities."""
    emb_table = params["embedding"]        # (V, E)
    w_ih = params["w_ih"]                  # (4H, E)  PyTorch layout
    w_hh = params["w_hh"]                  # (4H, H)
    b_ih = params["b_ih"]                  # (4H,)
    b_hh = params["b_hh"]                  # (4H,)
    fc_w = params["fc_w"]                  # (V, H)
    fc_b = params["fc_b"]                  # (V,)

    B, T = tokens.shape
    V, E = emb_table.shape
    H = w_hh.shape[1]

    # --- TPU-friendly padded sizes: (8, 128) vreg tile alignment. ---
    Bp = _round_up(B, 8)
    Hp = _round_up(H, 128)
    Vp = _round_up(V, 128)
    t_chunk = max(1, min(t_chunk, T))
    Tp = _round_up(T, t_chunk)
    n_chunks = Tp // t_chunk
    rows_per_chunk = t_chunk * Bp
    itemsize = jnp.dtype(param_dtype).itemsize

    # --- Glue: embedding gather directly in time-major flat layout. ---
    tok_tm = jnp.pad(jnp.transpose(tokens), ((0, Tp - T), (0, Bp - B)))   # (Tp, Bp)
    x2d = jnp.take(emb_table, tok_tm.reshape(Tp * Bp), axis=0)           # (Tp*Bp, E)
    x2d = x2d.astype(param_dtype)

    # --- Per-gate padded weights so gate k lives at columns [k*Hp, (k+1)*Hp). ---
    def pad_gate_weight(w, in_dim_pad):
        # w: (4H, Din)  ->  (Din_pad, 4*Hp), zero-padded per gate block.
        din = w.shape[1]
        w4 = w.reshape(4, H, din)
        w4 = jnp.pad(w4, ((0, 0), (0, Hp - H), (0, in_dim_pad - din)))
        return jnp.transpose(w4.reshape(4 * Hp, in_dim_pad))

    w_ih_p = pad_gate_weight(w_ih, E).astype(param_dtype)        # (E, 4Hp)
    w_hh_p = pad_gate_weight(w_hh, Hp).astype(param_dtype)       # (Hp, 4Hp)
    b_p = jnp.pad((b_ih + b_hh).reshape(4, H),
                  ((0, 0), (0, Hp - H))).reshape(1, 4 * Hp).astype(jnp.float32)

    fc_w_p = jnp.pad(jnp.transpose(fc_w),
                     ((0, Hp - H), (0, Vp - V))).astype(param_dtype)      # (Hp, Vp)
    # Padded vocab columns get a very negative bias so they vanish in log_softmax.
    fc_b_p = jnp.concatenate(
        [fc_b.astype(jnp.float32),
         jnp.full((Vp - V,), -1e30, jnp.float32)]).reshape(1, Vp)

    # --- Kernel 1: LSTM over time-chunks (sequential, h/c in persistent VMEM). ---
    k1_bytes = (2 * rows_per_chunk * E * itemsize                # x chunk (dbl buf)
                + 2 * rows_per_chunk * Hp * 4                    # hs chunk (dbl buf)
                + 2 * (E + Hp) * 4 * Hp * itemsize               # weights (dbl buf)
                + 2 * 4 * Hp * 4                                 # bias
                + rows_per_chunk * 4 * Hp * 4                    # xg scratch
                + 2 * Bp * Hp * 4)                               # h, c carries
    hs = pl.pallas_call(
        functools.partial(lstm_chunk_kernel, t_chunk=t_chunk, bp=Bp),
        out_shape=jax.ShapeDtypeStruct((Tp * Bp, Hp), jnp.float32),
        grid_spec=pltpu.PrefetchScalarGridSpec(
            num_scalar_prefetch=0,
            grid=(n_chunks,),
            in_specs=[
                pl.BlockSpec((rows_per_chunk, E), lambda i: (i, 0)),
                pl.BlockSpec((E, 4 * Hp), lambda i: (0, 0)),
                pl.BlockSpec((Hp, 4 * Hp), lambda i: (0, 0)),
                pl.BlockSpec((1, 4 * Hp), lambda i: (0, 0)),
            ],
            out_specs=pl.BlockSpec((rows_per_chunk, Hp), lambda i: (i, 0)),
            scratch_shapes=[
                pltpu.VMEM((rows_per_chunk, 4 * Hp), jnp.float32),   # xg
                pltpu.VMEM((Bp, Hp), jnp.float32),                   # h carry
                pltpu.VMEM((Bp, Hp), jnp.float32),                   # c carry
            ],
        ),
        compiler_params=pltpu.CompilerParams(
            dimension_semantics=("arbitrary",),
            vmem_limit_bytes=_vmem_limit(k1_bytes)),
    )(x2d, w_ih_p, w_hh_p, b_p)

    # --- Kernel 2: FC + log_softmax, parallel over row tiles (megacore friendly). ---
    fc_rows = rows_per_chunk                    # multiple of 8, divides Tp*Bp
    n_row_tiles = (Tp * Bp) // fc_rows
    k2_bytes = (2 * fc_rows * Hp * 4            # hs tile (dbl buf)
                + 2 * Hp * Vp * itemsize        # fc weight
                + 2 * Vp * 4                    # fc bias
                + 2 * fc_rows * Vp * 4)         # out tile (dbl buf)
    out_flat = pl.pallas_call(
        fc_logsoftmax_kernel,
        out_shape=jax.ShapeDtypeStruct((Tp * Bp, Vp), jnp.float32),
        grid_spec=pltpu.PrefetchScalarGridSpec(
            num_scalar_prefetch=0,
            grid=(n_row_tiles,),
            in_specs=[
                pl.BlockSpec((fc_rows, Hp), lambda i: (i, 0)),
                pl.BlockSpec((Hp, Vp), lambda i: (0, 0)),
                pl.BlockSpec((1, Vp), lambda i: (0, 0)),
            ],
            out_specs=pl.BlockSpec((fc_rows, Vp), lambda i: (i, 0)),
        ),
        compiler_params=pltpu.CompilerParams(
            dimension_semantics=("parallel",),
            vmem_limit_bytes=_vmem_limit(k2_bytes)),
    )(hs, fc_w_p, fc_b_p)

    # Un-pad and return in PyTorch's batch-first (B, T, V) convention.
    out_tm = out_flat.reshape(Tp, Bp, Vp)[:T, :B, :V]
    return jnp.transpose(out_tm, (1, 0, 2))


# ----------------------------------------------------------------------------- #
# Pure-JAX reference (matches PyTorch semantics) for the correctness check.
# ----------------------------------------------------------------------------- #
def rnn_model_reference(tokens, params):
    emb_table = params["embedding"]
    w_ih, w_hh = params["w_ih"], params["w_hh"]
    b = params["b_ih"] + params["b_hh"]
    fc_w, fc_b = params["fc_w"], params["fc_b"]
    H = w_hh.shape[1]

    embed = jnp.take(emb_table, tokens, axis=0)           # (B, T, E)
    B, T, E = embed.shape

    def step(carry, x_t):
        h, c = carry
        gates = x_t @ w_ih.T + h @ w_hh.T + b
        i_g = jax.nn.sigmoid(gates[:, 0 * H:1 * H])
        f_g = jax.nn.sigmoid(gates[:, 1 * H:2 * H])
        g_g = jnp.tanh(gates[:, 2 * H:3 * H])
        o_g = jax.nn.sigmoid(gates[:, 3 * H:4 * H])
        c_new = f_g * c + i_g * g_g
        h_new = o_g * jnp.tanh(c_new)
        return (h_new, c_new), h_new

    h0 = jnp.zeros((B, H), jnp.float32)
    c0 = jnp.zeros((B, H), jnp.float32)
    _, hs = lax.scan(step, (h0, c0), jnp.transpose(embed, (1, 0, 2)))
    hs = jnp.transpose(hs, (1, 0, 2))                     # (B, T, H)
    logits = hs @ fc_w.T + fc_b
    return jax.nn.log_softmax(logits, axis=2)


if __name__ == "__main__":
    B, T = 2, 8
    vocab_size, embedding_dim, hidden_dim = 32, 16, 32

    key = jax.random.PRNGKey(0)
    ks = jax.random.split(key, 8)
    params = {
        "embedding": 0.1 * jax.random.normal(ks[0], (vocab_size, embedding_dim), jnp.float32),
        "w_ih": 0.1 * jax.random.normal(ks[1], (4 * hidden_dim, embedding_dim), jnp.float32),
        "w_hh": 0.1 * jax.random.normal(ks[2], (4 * hidden_dim, hidden_dim), jnp.float32),
        "b_ih": 0.1 * jax.random.normal(ks[3], (4 * hidden_dim,), jnp.float32),
        "b_hh": 0.1 * jax.random.normal(ks[4], (4 * hidden_dim,), jnp.float32),
        "fc_w": 0.1 * jax.random.normal(ks[5], (vocab_size, hidden_dim), jnp.float32),
        "fc_b": 0.1 * jax.random.normal(ks[6], (vocab_size,), jnp.float32),
    }
    tokens = jax.random.randint(ks[7], (B, T), 0, vocab_size, dtype=jnp.int32)

    # f32 params here so the result matches the reference bit-for-bit (within tol);
    # pass param_dtype=jnp.bfloat16 on v6e/v7x for the bf16-weight fast path.
    out = jax.block_until_ready(rnn_model_forward(tokens, params))
    ref = jax.block_until_ready(rnn_model_reference(tokens, params))

    assert out.shape == (B, T, vocab_size)
    assert jnp.allclose(out, ref, atol=1e-4, rtol=1e-4), "mismatch vs reference"
    print("KERNEL_OK")
</pallas_src>

<mosaic_0001>
module attributes {stable_mosaic.version = 11 : i64} {
  func.func @lstm_chunk_kernel(%arg0: i32, %arg1: memref<64x16xf32, #tpu.memory_space<vmem>>, %arg2: memref<16x512xf32, #tpu.memory_space<vmem>>, %arg3: memref<128x512xf32, #tpu.memory_space<vmem>>, %arg4: memref<1x512xf32, #tpu.memory_space<vmem>>, %arg5: memref<64x128xf32, #tpu.memory_space<vmem>>, %arg6: memref<64x512xf32, #tpu.memory_space<vmem>>, %arg7: memref<8x128xf32, #tpu.memory_space<vmem>>, %arg8: memref<8x128xf32, #tpu.memory_space<vmem>>) attributes {dimension_semantics = [#tpu.dimension_semantics<arbitrary>], iteration_bounds = array<i64: 1>, scalar_prefetch = 0 : i64, scratch_operands = 3 : i64, tpu.core_type = #tpu.core_type<tc>, window_params = [{transform_indices = @transform_0, window_bounds = array<i64: 64, 16>}, {pipeline_mode = #tpu.pipeline_mode<synchronous>, transform_indices = @transform_1, window_bounds = array<i64: 16, 512>}, {pipeline_mode = #tpu.pipeline_mode<synchronous>, transform_indices = @transform_2, window_bounds = array<i64: 128, 512>}, {pipeline_mode = #tpu.pipeline_mode<synchronous>, transform_indices = @transform_3, window_bounds = array<i64: 1, 512>}, {transform_indices = @transform_4, window_bounds = array<i64: 64, 128>}]} {
    %c0_i32 = arith.constant 0 : i32
    %0 = arith.cmpi eq, %arg0, %c0_i32 : i32
    %1 = arith.extui %0 : i1 to i32
    %c0_i32_0 = arith.constant 0 : i32
    %2 = arith.cmpi ne, %1, %c0_i32_0 : i32
    scf.if %2 {
      %cst_75 = arith.constant 0.000000e+00 : f32
      %279 = vector.broadcast %cst_75 : f32 to vector<8x128xf32>
      %c0_76 = arith.constant 0 : index
      %c0_77 = arith.constant 0 : index
      %280 = vector.load %arg7[%c0_76, %c0_77] : memref<8x128xf32, #tpu.memory_space<vmem>>, vector<8x128xf32>
      tpu.vector_store %arg7[%c0_76, %c0_77], %279 {strides = array<i32>} : memref<8x128xf32, #tpu.memory_space<vmem>>, vector<8x128xf32>,
      %cst_78 = arith.constant 0.000000e+00 : f32
      %281 = vector.broadcast %cst_78 : f32 to vector<8x128xf32>
      %c0_79 = arith.constant 0 : index
      %c0_80 = arith.constant 0 : index
      %282 = vector.load %arg8[%c0_79, %c0_80] : memref<8x128xf32, #tpu.memory_space<vmem>>, vector<8x128xf32>
      tpu.vector_store %arg8[%c0_79, %c0_80], %281 {strides = array<i32>} : memref<8x128xf32, #tpu.memory_space<vmem>>, vector<8x128xf32>,
    } else {
    }
    %c0 = arith.constant 0 : index
    %c0_1 = arith.constant 0 : index
    %3 = vector.load %arg1[%c0, %c0_1] : memref<64x16xf32, #tpu.memory_space<vmem>>, vector<64x16xf32>
    %c0_2 = arith.constant 0 : index
    %c0_3 = arith.constant 0 : index
    %4 = vector.load %arg2[%c0_2, %c0_3] : memref<16x512xf32, #tpu.memory_space<vmem>>, vector<16x512xf32>
    %cst = arith.constant dense<0.000000e+00> : vector<64x512xf32>
    %5 = tpu.matmul %3, %4, %cst {dimension_numbers = #tpu.dot_dimension_numbers<[1], [0], [0], [1], [0, 0, 1, 1], [], []>} : vector<64x16xf32>, vector<16x512xf32>, vector<64x512xf32> -> vector<64x512xf32>
    %c0_4 = arith.constant 0 : index
    %c0_5 = arith.constant 0 : index
    %6 = vector.load %arg4[%c0_4, %c0_5] : memref<1x512xf32, #tpu.memory_space<vmem>>, vector<1x512xf32>
    %7 = vector.broadcast %6 : vector<1x512xf32> to vector<64x512xf32>
    %8 = arith.addf %5, %7 : vector<64x512xf32>
    %c0_6 = arith.constant 0 : index
    %c0_7 = arith.constant 0 : index
    %9 = vector.load %arg6[%c0_6, %c0_7] : memref<64x512xf32, #tpu.memory_space<vmem>>, vector<64x512xf32>
    tpu.vector_store %arg6[%c0_6, %c0_7], %8 {strides = array<i32>} : memref<64x512xf32, #tpu.memory_space<vmem>>, vector<64x512xf32>,
    %c0_8 = arith.constant 0 : index
    %c0_9 = arith.constant 0 : index
    %10 = vector.load %arg3[%c0_8, %c0_9] : memref<128x512xf32, #tpu.memory_space<vmem>>, vector<128x512xf32>
    %c0_10 = arith.constant 0 : index
    %c0_11 = arith.constant 0 : index
    %11 = vector.load %arg7[%c0_10, %c0_11] : memref<8x128xf32, #tpu.memory_space<vmem>>, vector<8x128xf32>
    %c0_12 = arith.constant 0 : index
    %c0_13 = arith.constant 0 : index
    %12 = vector.load %arg8[%c0_12, %c0_13] : memref<8x128xf32, #tpu.memory_space<vmem>>, vector<8x128xf32>
    %c0_i32_14 = arith.constant 0 : i32
    %c8_i32 = arith.constant 8 : i32
    %13 = arith.muli %c0_i32_14, %c8_i32 : i32
    %14 = tpu.assume_multiple %13, 8 : i32
    %15 = arith.index_cast %14 : i32 to index
    %c0_15 = arith.constant 0 : index
    %16 = vector.load %arg6[%15, %c0_15] : memref<64x512xf32, #tpu.memory_space<vmem>>, vector<8x512xf32>
    %cst_16 = arith.constant dense<0.000000e+00> : vector<8x512xf32>
    %17 = tpu.matmul %11, %10, %cst_16 {dimension_numbers = #tpu.dot_dimension_numbers<[1], [0], [0], [1], [0, 0, 1, 1], [], []>} : vector<8x128xf32>, vector<128x512xf32>, vector<8x512xf32> -> vector<8x512xf32>
    %18 = arith.addf %16, %17 : vector<8x512xf32>
    %19 = vector.extract_strided_slice %18 {offsets = [0, 0], sizes = [8, 128], strides = [1, 1]} : vector<8x512xf32> to vector<8x128xf32>
    %20 = arith.negf %19 : vector<8x128xf32>
    %21 = math.exp %20 : vector<8x128xf32>
    %cst_17 = arith.constant 1.000000e+00 : f32
    %22 = vector.broadcast %cst_17 : f32 to vector<8x128xf32>
    %23 = arith.addf %22, %21 : vector<8x128xf32>
    %24 = arith.divf %22, %23 : vector<8x128xf32>
    %25 = vector.extract_strided_slice %18 {offsets = [0, 128], sizes = [8, 128], strides = [1, 1]} : vector<8x512xf32> to vector<8x128xf32>
    %26 = arith.negf %25 : vector<8x128xf32>
    %27 = math.exp %26 : vector<8x128xf32>
    %cst_18 = arith.constant 1.000000e+00 : f32
    %28 = vector.broadcast %cst_18 : f32 to vector<8x128xf32>
    %29 = arith.addf %28, %27 : vector<8x128xf32>
    %30 = arith.divf %28, %29 : vector<8x128xf32>
    %31 = vector.extract_strided_slice %18 {offsets = [0, 256], sizes = [8, 128], strides = [1, 1]} : vector<8x512xf32> to vector<8x128xf32>
    %32 = math.tanh %31 : vector<8x128xf32>
    %33 = vector.extract_strided_slice %18 {offsets = [0, 384], sizes = [8, 128], strides = [1, 1]} : vector<8x512xf32> to vector<8x128xf32>
    %34 = arith.negf %33 : vector<8x128xf32>
    %35 = math.exp %34 : vector<8x128xf32>
    %cst_19 = arith.constant 1.000000e+00 : f32
    %36 = vector.broadcast %cst_19 : f32 to vector<8x128xf32>
    %37 = arith.addf %36, %35 : vector<8x128xf32>
    %38 = arith.divf %36, %37 : vector<8x128xf32>
    %39 = arith.mulf %30, %12 : vector<8x128xf32>
    %40 = arith.mulf %24, %32 : vector<8x128xf32>
    %41 = arith.addf %39, %40 : vector<8x128xf32>
    %42 = math.tanh %41 : vector<8x128xf32>
    %43 = arith.mulf %38, %42 : vector<8x128xf32>
    %44 = arith.index_cast %14 : i32 to index
    %c0_20 = arith.constant 0 : index
    %45 = vector.load %arg5[%44, %c0_20] : memref<64x128xf32, #tpu.memory_space<vmem>>, vector<8x128xf32>
    tpu.vector_store %arg5[%44, %c0_20], %43 {strides = array<i32>} : memref<64x128xf32, #tpu.memory_space<vmem>>, vector<8x128xf32>,
    %c1_i32 = arith.constant 1 : i32
    %c8_i32_21 = arith.constant 8 : i32
    %46 = arith.muli %c1_i32, %c8_i32_21 : i32
    %47 = tpu.assume_multiple %46, 8 : i32
    %48 = arith.index_cast %47 : i32 to index
    %c0_22 = arith.constant 0 : index
    %49 = vector.load %arg6[%48, %c0_22] : memref<64x512xf32, #tpu.memory_space<vmem>>, vector<8x512xf32>
    %cst_23 = arith.constant dense<0.000000e+00> : vector<8x512xf32>
    %50 = tpu.matmul %43, %10, %cst_23 {dimension_numbers = #tpu.dot_dimension_numbers<[1], [0], [0], [1], [0, 0, 1, 1], [], []>} : vector<8x128xf32>, vector<128x512xf32>, vector<8x512xf32> -> vector<8x512xf32>
    %51 = arith.addf %49, %50 : vector<8x512xf32>
    %52 = vector.extract_strided_slice %51 {offsets = [0, 0], sizes = [8, 128], strides = [1, 1]} : vector<8x512xf32> to vector<8x128xf32>
    %53 = arith.negf %52 : vector<8x128xf32>
    %54 = math.exp %53 : vector<8x128xf32>
    %cst_24 = arith.constant 1.000000e+00 : f32
    %55 = vector.broadcast %cst_24 : f32 to vector<8x128xf32>
    %56 = arith.addf %55, %54 : vector<8x128xf32>
    %57 = arith.divf %55, %56 : vector<8x128xf32>
    %58 = vector.extract_strided_slice %51 {offsets = [0, 128], sizes = [8, 128], strides = [1, 1]} : vector<8x512xf32> to vector<8x128xf32>
    %59 = arith.negf %58 : vector<8x128xf32>
    %60 = math.exp %59 : vector<8x128xf32>
    %cst_25 = arith.constant 1.000000e+00 : f32
    %61 = vector.broadcast %cst_25 : f32 to vector<8x128xf32>
    %62 = arith.addf %61, %60 : vector<8x128xf32>
    %63 = arith.divf %61, %62 : vector<8x128xf32>
    %64 = vector.extract_strided_slice %51 {offsets = [0, 256], sizes = [8, 128], strides = [1, 1]} : vector<8x512xf32> to vector<8x128xf32>
    %65 = math.tanh %64 : vector<8x128xf32>
    %66 = vector.extract_strided_slice %51 {offsets = [0, 384], sizes = [8, 128], strides = [1, 1]} : vector<8x512xf32> to vector<8x128xf32>
    %67 = arith.negf %66 : vector<8x128xf32>
    %68 = math.exp %67 : vector<8x128xf32>
    %cst_26 = arith.constant 1.000000e+00 : f32
    %69 = vector.broadcast %cst_26 : f32 to vector<8x128xf32>
    %70 = arith.addf %69, %68 : vector<8x128xf32>
    %71 = arith.divf %69, %70 : vector<8x128xf32>
    %72 = arith.mulf %63, %41 : vector<8x128xf32>
    %73 = arith.mulf %57, %65 : vector<8x128xf32>
    %74 = arith.addf %72, %73 : vector<8x128xf32>
    %75 = math.tanh %74 : vector<8x128xf32>
    %76 = arith.mulf %71, %75 : vector<8x128xf32>
    %77 = arith.index_cast %47 : i32 to index
    %c0_27 = arith.constant 0 : index
    %78 = vector.load %arg5[%77, %c0_27] : memref<64x128xf32, #tpu.memory_space<vmem>>, vector<8x128xf32>
    tpu.vector_store %arg5[%77, %c0_27], %76 {strides = array<i32>} : memref<64x128xf32, #tpu.memory_space<vmem>>, vector<8x128xf32>,
    %c2_i32 = arith.constant 2 : i32
    %c8_i32_28 = arith.constant 8 : i32
    %79 = arith.muli %c2_i32, %c8_i32_28 : i32
    %80 = tpu.assume_multiple %79, 8 : i32
    %81 = arith.index_cast %80 : i32 to index
    %c0_29 = arith.constant 0 : index
    %82 = vector.load %arg6[%81, %c0_29] : memref<64x512xf32, #tpu.memory_space<vmem>>, vector<8x512xf32>
    %cst_30 = arith.constant dense<0.000000e+00> : vector<8x512xf32>
    %83 = tpu.matmul %76, %10, %cst_30 {dimension_numbers = #tpu.dot_dimension_numbers<[1], [0], [0], [1], [0, 0, 1, 1], [], []>} : vector<8x128xf32>, vector<128x512xf32>, vector<8x512xf32> -> vector<8x512xf32>
    %84 = arith.addf %82, %83 : vector<8x512xf32>
    %85 = vector.extract_strided_slice %84 {offsets = [0, 0], sizes = [8, 128], strides = [1, 1]} : vector<8x512xf32> to vector<8x128xf32>
    %86 = arith.negf %85 : vector<8x128xf32>
    %87 = math.exp %86 : vector<8x128xf32>
    %cst_31 = arith.constant 1.000000e+00 : f32
    %88 = vector.broadcast %cst_31 : f32 to vector<8x128xf32>
    %89 = arith.addf %88, %87 : vector<8x128xf32>
    %90 = arith.divf %88, %89 : vector<8x128xf32>
    %91 = vector.extract_strided_slice %84 {offsets = [0, 128], sizes = [8, 128], strides = [1, 1]} : vector<8x512xf32> to vector<8x128xf32>
    %92 = arith.negf %91 : vector<8x128xf32>
    %93 = math.exp %92 : vector<8x128xf32>
    %cst_32 = arith.constant 1.000000e+00 : f32
    %94 = vector.broadcast %cst_32 : f32 to vector<8x128xf32>
    %95 = arith.addf %94, %93 : vector<8x128xf32>
    %96 = arith.divf %94, %95 : vector<8x128xf32>
    %97 = vector.extract_strided_slice %84 {offsets = [0, 256], sizes = [8, 128], strides = [1, 1]} : vector<8x512xf32> to vector<8x128xf32>
    %98 = math.tanh %97 : vector<8x128xf32>
    %99 = vector.extract_strided_slice %84 {offsets = [0, 384], sizes = [8, 128], strides = [1, 1]} : vector<8x512xf32> to vector<8x128xf32>
    %100 = arith.negf %99 : vector<8x128xf32>
    %101 = math.exp %100 : vector<8x128xf32>
    %cst_33 = arith.constant 1.000000e+00 : f32
    %102 = vector.broadcast %cst_33 : f32 to vector<8x128xf32>
    %103 = arith.addf %102, %101 : vector<8x128xf32>
    %104 = arith.divf %102, %103 : vector<8x128xf32>
    %105 = arith.mulf %96, %74 : vector<8x128xf32>
    %106 = arith.mulf %90, %98 : vector<8x128xf32>
    %107 = arith.addf %105, %106 : vector<8x128xf32>
    %108 = math.tanh %107 : vector<8x128xf32>
    %109 = arith.mulf %104, %108 : vector<8x128xf32>
    %110 = arith.index_cast %80 : i32 to index
    %c0_34 = arith.constant 0 : index
    %111 = vector.load %arg5[%110, %c0_34] : memref<64x128xf32, #tpu.memory_space<vmem>>, vector<8x128xf32>
    tpu.vector_store %arg5[%110, %c0_34], %109 {strides = array<i32>} : memref<64x128xf32, #tpu.memory_space<vmem>>, vector<8x128xf32>,
    %c3_i32 = arith.constant 3 : i32
    %c8_i32_35 = arith.constant 8 : i32
    %112 = arith.muli %c3_i32, %c8_i32_35 : i32
    %113 = tpu.assume_multiple %112, 8 : i32
    %114 = arith.index_cast %113 : i32 to index
    %c0_36 = arith.constant 0 : index
    %115 = vector.load %arg6[%114, %c0_36] : memref<64x512xf32, #tpu.memory_space<vmem>>, vector<8x512xf32>
    %cst_37 = arith.constant dense<0.000000e+00> : vector<8x512xf32>
    %116 = tpu.matmul %109, %10, %cst_37 {dimension_numbers = #tpu.dot_dimension_numbers<[1], [0], [0], [1], [0, 0, 1, 1], [], []>} : vector<8x128xf32>, vector<128x512xf32>, vector<8x512xf32> -> vector<8x512xf32>
    %117 = arith.addf %115, %116 : vector<8x512xf32>
    %118 = vector.extract_strided_slice %117 {offsets = [0, 0], sizes = [8, 128], strides = [1, 1]} : vector<8x512xf32> to vector<8x128xf32>
    %119 = arith.negf %118 : vector<8x128xf32>
    %120 = math.exp %119 : vector<8x128xf32>
    %cst_38 = arith.constant 1.000000e+00 : f32
    %121 = vector.broadcast %cst_38 : f32 to vector<8x128xf32>
    %122 = arith.addf %121, %120 : vector<8x128xf32>
    %123 = arith.divf %121, %122 : vector<8x128xf32>
    %124 = vector.extract_strided_slice %117 {offsets = [0, 128], sizes = [8, 128], strides = [1, 1]} : vector<8x512xf32> to vector<8x128xf32>
    %125 = arith.negf %124 : vector<8x128xf32>
    %126 = math.exp %125 : vector<8x128xf32>
    %cst_39 = arith.constant 1.000000e+00 : f32
    %127 = vector.broadcast %cst_39 : f32 to vector<8x128xf32>
    %128 = arith.addf %127, %126 : vector<8x128xf32>
    %129 = arith.divf %127, %128 : vector<8x128xf32>
    %130 = vector.extract_strided_slice %117 {offsets = [0, 256], sizes = [8, 128], strides = [1, 1]} : vector<8x512xf32> to vector<8x128xf32>
    %131 = math.tanh %130 : vector<8x128xf32>
    %132 = vector.extract_strided_slice %117 {offsets = [0, 384], sizes = [8, 128], strides = [1, 1]} : vector<8x512xf32> to vector<8x128xf32>
    %133 = arith.negf %132 : vector<8x128xf32>
    %134 = math.exp %133 : vector<8x128xf32>
    %cst_40 = arith.constant 1.000000e+00 : f32
    %135 = vector.broadcast %cst_40 : f32 to vector<8x128xf32>
    %136 = arith.addf %135, %134 : vector<8x128xf32>
    %137 = arith.divf %135, %136 : vector<8x128xf32>
    %138 = arith.mulf %129, %107 : vector<8x128xf32>
    %139 = arith.mulf %123, %131 : vector<8x128xf32>
    %140 = arith.addf %138, %139 : vector<8x128xf32>
    %141 = math.tanh %140 : vector<8x128xf32>
    %142 = arith.mulf %137, %141 : vector<8x128xf32>
    %143 = arith.index_cast %113 : i32 to index
    %c0_41 = arith.constant 0 : index
    %144 = vector.load %arg5[%143, %c0_41] : memref<64x128xf32, #tpu.memory_space<vmem>>, vector<8x128xf32>
    tpu.vector_store %arg5[%143, %c0_41], %142 {strides = array<i32>} : memref<64x128xf32, #tpu.memory_space<vmem>>, vector<8x128xf32>,
    %c4_i32 = arith.constant 4 : i32
    %c8_i32_42 = arith.constant 8 : i32
    %145 = arith.muli %c4_i32, %c8_i32_42 : i32
    %146 = tpu.assume_multiple %145, 8 : i32
    %147 = arith.index_cast %146 : i32 to index
    %c0_43 = arith.constant 0 : index
    %148 = vector.load %arg6[%147, %c0_43] : memref<64x512xf32, #tpu.memory_space<vmem>>, vector<8x512xf32>
    %cst_44 = arith.constant dense<0.000000e+00> : vector<8x512xf32>
    %149 = tpu.matmul %142, %10, %cst_44 {dimension_numbers = #tpu.dot_dimension_numbers<[1], [0], [0], [1], [0, 0, 1, 1], [], []>} : vector<8x128xf32>, vector<128x512xf32>, vector<8x512xf32> -> vector<8x512xf32>
    %150 = arith.addf %148, %149 : vector<8x512xf32>
    %151 = vector.extract_strided_slice %150 {offsets = [0, 0], sizes = [8, 128], strides = [1, 1]} : vector<8x512xf32> to vector<8x128xf32>
    %152 = arith.negf %151 : vector<8x128xf32>
    %153 = math.exp %152 : vector<8x128xf32>
    %cst_45 = arith.constant 1.000000e+00 : f32
    %154 = vector.broadcast %cst_45 : f32 to vector<8x128xf32>
    %155 = arith.addf %154, %153 : vector<8x128xf32>
    %156 = arith.divf %154, %155 : vector<8x128xf32>
    %157 = vector.extract_strided_slice %150 {offsets = [0, 128], sizes = [8, 128], strides = [1, 1]} : vector<8x512xf32> to vector<8x128xf32>
    %158 = arith.negf %157 : vector<8x128xf32>
    %159 = math.exp %158 : vector<8x128xf32>
    %cst_46 = arith.constant 1.000000e+00 : f32
    %160 = vector.broadcast %cst_46 : f32 to vector<8x128xf32>
    %161 = arith.addf %160, %159 : vector<8x128xf32>
    %162 = arith.divf %160, %161 : vector<8x128xf32>
    %163 = vector.extract_strided_slice %150 {offsets = [0, 256], sizes = [8, 128], strides = [1, 1]} : vector<8x512xf32> to vector<8x128xf32>
    %164 = math.tanh %163 : vector<8x128xf32>
    %165 = vector.extract_strided_slice %150 {offsets = [0, 384], sizes = [8, 128], strides = [1, 1]} : vector<8x512xf32> to vector<8x128xf32>
    %166 = arith.negf %165 : vector<8x128xf32>
    %167 = math.exp %166 : vector<8x128xf32>
    %cst_47 = arith.constant 1.000000e+00 : f32
    %168 = vector.broadcast %cst_47 : f32 to vector<8x128xf32>
    %169 = arith.addf %168, %167 : vector<8x128xf32>
    %170 = arith.divf %168, %169 : vector<8x128xf32>
    %171 = arith.mulf %162, %140 : vector<8x128xf32>
    %172 = arith.mulf %156, %164 : vector<8x128xf32>
    %173 = arith.addf %171, %172 : vector<8x128xf32>
    %174 = math.tanh %173 : vector<8x128xf32>
    %175 = arith.mulf %170, %174 : vector<8x128xf32>
    %176 = arith.index_cast %146 : i32 to index
    %c0_48 = arith.constant 0 : index
    %177 = vector.load %arg5[%176, %c0_48] : memref<64x128xf32, #tpu.memory_space<vmem>>, vector<8x128xf32>
    tpu.vector_store %arg5[%176, %c0_48], %175 {strides = array<i32>} : memref<64x128xf32, #tpu.memory_space<vmem>>, vector<8x128xf32>,
    %c5_i32 = arith.constant 5 : i32
    %c8_i32_49 = arith.constant 8 : i32
    %178 = arith.muli %c5_i32, %c8_i32_49 : i32
    %179 = tpu.assume_multiple %178, 8 : i32
    %180 = arith.index_cast %179 : i32 to index
    %c0_50 = arith.constant 0 : index
    %181 = vector.load %arg6[%180, %c0_50] : memref<64x512xf32, #tpu.memory_space<vmem>>, vector<8x512xf32>
    %cst_51 = arith.constant dense<0.000000e+00> : vector<8x512xf32>
    %182 = tpu.matmul %175, %10, %cst_51 {dimension_numbers = #tpu.dot_dimension_numbers<[1], [0], [0], [1], [0, 0, 1, 1], [], []>} : vector<8x128xf32>, vector<128x512xf32>, vector<8x512xf32> -> vector<8x512xf32>
    %183 = arith.addf %181, %182 : vector<8x512xf32>
    %184 = vector.extract_strided_slice %183 {offsets = [0, 0], sizes = [8, 128], strides = [1, 1]} : vector<8x512xf32> to vector<8x128xf32>
    %185 = arith.negf %184 : vector<8x128xf32>
    %186 = math.exp %185 : vector<8x128xf32>
    %cst_52 = arith.constant 1.000000e+00 : f32
    %187 = vector.broadcast %cst_52 : f32 to vector<8x128xf32>
    %188 = arith.addf %187, %186 : vector<8x128xf32>
    %189 = arith.divf %187, %188 : vector<8x128xf32>
    %190 = vector.extract_strided_slice %183 {offsets = [0, 128], sizes = [8, 128], strides = [1, 1]} : vector<8x512xf32> to vector<8x128xf32>
    %191 = arith.negf %190 : vector<8x128xf32>
    %192 = math.exp %191 : vector<8x128xf32>
    %cst_53 = arith.constant 1.000000e+00 : f32
    %193 = vector.broadcast %cst_53 : f32 to vector<8x128xf32>
    %194 = arith.addf %193, %192 : vector<8x128xf32>
    %195 = arith.divf %193, %194 : vector<8x128xf32>
    %196 = vector.extract_strided_slice %183 {offsets = [0, 256], sizes = [8, 128], strides = [1, 1]} : vector<8x512xf32> to vector<8x128xf32>
    %197 = math.tanh %196 : vector<8x128xf32>
    %198 = vector.extract_strided_slice %183 {offsets = [0, 384], sizes = [8, 128], strides = [1, 1]} : vector<8x512xf32> to vector<8x128xf32>
    %199 = arith.negf %198 : vector<8x128xf32>
    %200 = math.exp %199 : vector<8x128xf32>
    %cst_54 = arith.constant 1.000000e+00 : f32
    %201 = vector.broadcast %cst_54 : f32 to vector<8x128xf32>
    %202 = arith.addf %201, %200 : vector<8x128xf32>
    %203 = arith.divf %201, %202 : vector<8x128xf32>
    %204 = arith.mulf %195, %173 : vector<8x128xf32>
    %205 = arith.mulf %189, %197 : vector<8x128xf32>
    %206 = arith.addf %204, %205 : vector<8x128xf32>
    %207 = math.tanh %206 : vector<8x128xf32>
    %208 = arith.mulf %203, %207 : vector<8x128xf32>
    %209 = arith.index_cast %179 : i32 to index
    %c0_55 = arith.constant 0 : index
    %210 = vector.load %arg5[%209, %c0_55] : memref<64x128xf32, #tpu.memory_space<vmem>>, vector<8x128xf32>
    tpu.vector_store %arg5[%209, %c0_55], %208 {strides = array<i32>} : memref<64x128xf32, #tpu.memory_space<vmem>>, vector<8x128xf32>,
    %c6_i32 = arith.constant 6 : i32
    %c8_i32_56 = arith.constant 8 : i32
    %211 = arith.muli %c6_i32, %c8_i32_56 : i32
    %212 = tpu.assume_multiple %211, 8 : i32
    %213 = arith.index_cast %212 : i32 to index
    %c0_57 = arith.constant 0 : index
    %214 = vector.load %arg6[%213, %c0_57] : memref<64x512xf32, #tpu.memory_space<vmem>>, vector<8x512xf32>
    %cst_58 = arith.constant dense<0.000000e+00> : vector<8x512xf32>
    %215 = tpu.matmul %208, %10, %cst_58 {dimension_numbers = #tpu.dot_dimension_numbers<[1], [0], [0], [1], [0, 0, 1, 1], [], []>} : vector<8x128xf32>, vector<128x512xf32>, vector<8x512xf32> -> vector<8x512xf32>
    %216 = arith.addf %214, %215 : vector<8x512xf32>
    %217 = vector.extract_strided_slice %216 {offsets = [0, 0], sizes = [8, 128], strides = [1, 1]} : vector<8x512xf32> to vector<8x128xf32>
    %218 = arith.negf %217 : vector<8x128xf32>
    %219 = math.exp %218 : vector<8x128xf32>
    %cst_59 = arith.constant 1.000000e+00 : f32
    %220 = vector.broadcast %cst_59 : f32 to vector<8x128xf32>
    %221 = arith.addf %220, %219 : vector<8x128xf32>
    %222 = arith.divf %220, %221 : vector<8x128xf32>
    %223 = vector.extract_strided_slice %216 {offsets = [0, 128], sizes = [8, 128], strides = [1, 1]} : vector<8x512xf32> to vector<8x128xf32>
    %224 = arith.negf %223 : vector<8x128xf32>
    %225 = math.exp %224 : vector<8x128xf32>
    %cst_60 = arith.constant 1.000000e+00 : f32
    %226 = vector.broadcast %cst_60 : f32 to vector<8x128xf32>
    %227 = arith.addf %226, %225 : vector<8x128xf32>
    %228 = arith.divf %226, %227 : vector<8x128xf32>
    %229 = vector.extract_strided_slice %216 {offsets = [0, 256], sizes = [8, 128], strides = [1, 1]} : vector<8x512xf32> to vector<8x128xf32>
    %230 = math.tanh %229 : vector<8x128xf32>
    %231 = vector.extract_strided_slice %216 {offsets = [0, 384], sizes = [8, 128], strides = [1, 1]} : vector<8x512xf32> to vector<8x128xf32>
    %232 = arith.negf %231 : vector<8x128xf32>
    %233 = math.exp %232 : vector<8x128xf32>
    %cst_61 = arith.constant 1.000000e+00 : f32
    %234 = vector.broadcast %cst_61 : f32 to vector<8x128xf32>
    %235 = arith.addf %234, %233 : vector<8x128xf32>
    %236 = arith.divf %234, %235 : vector<8x128xf32>
    %237 = arith.mulf %228, %206 : vector<8x128xf32>
    %238 = arith.mulf %222, %230 : vector<8x128xf32>
    %239 = arith.addf %237, %238 : vector<8x128xf32>
    %240 = math.tanh %239 : vector<8x128xf32>
    %241 = arith.mulf %236, %240 : vector<8x128xf32>
    %242 = arith.index_cast %212 : i32 to index
    %c0_62 = arith.constant 0 : index
    %243 = vector.load %arg5[%242, %c0_62] : memref<64x128xf32, #tpu.memory_space<vmem>>, vector<8x128xf32>
    tpu.vector_store %arg5[%242, %c0_62], %241 {strides = array<i32>} : memref<64x128xf32, #tpu.memory_space<vmem>>, vector<8x128xf32>,
    %c7_i32 = arith.constant 7 : i32
    %c8_i32_63 = arith.constant 8 : i32
    %244 = arith.muli %c7_i32, %c8_i32_63 : i32
    %245 = tpu.assume_multiple %244, 8 : i32
    %246 = arith.index_cast %245 : i32 to index
    %c0_64 = arith.constant 0 : index
    %247 = vector.load %arg6[%246, %c0_64] : memref<64x512xf32, #tpu.memory_space<vmem>>, vector<8x512xf32>
    %cst_65 = arith.constant dense<0.000000e+00> : vector<8x512xf32>
    %248 = tpu.matmul %241, %10, %cst_65 {dimension_numbers = #tpu.dot_dimension_numbers<[1], [0], [0], [1], [0, 0, 1, 1], [], []>} : vector<8x128xf32>, vector<128x512xf32>, vector<8x512xf32> -> vector<8x512xf32>
    %249 = arith.addf %247, %248 : vector<8x512xf32>
    %250 = vector.extract_strided_slice %249 {offsets = [0, 0], sizes = [8, 128], strides = [1, 1]} : vector<8x512xf32> to vector<8x128xf32>
    %251 = arith.negf %250 : vector<8x128xf32>
    %252 = math.exp %251 : vector<8x128xf32>
    %cst_66 = arith.constant 1.000000e+00 : f32
    %253 = vector.broadcast %cst_66 : f32 to vector<8x128xf32>
    %254 = arith.addf %253, %252 : vector<8x128xf32>
    %255 = arith.divf %253, %254 : vector<8x128xf32>
    %256 = vector.extract_strided_slice %249 {offsets = [0, 128], sizes = [8, 128], strides = [1, 1]} : vector<8x512xf32> to vector<8x128xf32>
    %257 = arith.negf %256 : vector<8x128xf32>
    %258 = math.exp %257 : vector<8x128xf32>
    %cst_67 = arith.constant 1.000000e+00 : f32
    %259 = vector.broadcast %cst_67 : f32 to vector<8x128xf32>
    %260 = arith.addf %259, %258 : vector<8x128xf32>
    %261 = arith.divf %259, %260 : vector<8x128xf32>
    %262 = vector.extract_strided_slice %249 {offsets = [0, 256], sizes = [8, 128], strides = [1, 1]} : vector<8x512xf32> to vector<8x128xf32>
    %263 = math.tanh %262 : vector<8x128xf32>
    %264 = vector.extract_strided_slice %249 {offsets = [0, 384], sizes = [8, 128], strides = [1, 1]} : vector<8x512xf32> to vector<8x128xf32>
    %265 = arith.negf %264 : vector<8x128xf32>
    %266 = math.exp %265 : vector<8x128xf32>
    %cst_68 = arith.constant 1.000000e+00 : f32
    %267 = vector.broadcast %cst_68 : f32 to vector<8x128xf32>
    %268 = arith.addf %267, %266 : vector<8x128xf32>
    %269 = arith.divf %267, %268 : vector<8x128xf32>
    %270 = arith.mulf %261, %239 : vector<8x128xf32>
    %271 = arith.mulf %255, %263 : vector<8x128xf32>
    %272 = arith.addf %270, %271 : vector<8x128xf32>
    %273 = math.tanh %272 : vector<8x128xf32>
    %274 = arith.mulf %269, %273 : vector<8x128xf32>
    %275 = arith.index_cast %245 : i32 to index
    %c0_69 = arith.constant 0 : index
    %276 = vector.load %arg5[%275, %c0_69] : memref<64x128xf32, #tpu.memory_space<vmem>>, vector<8x128xf32>
    tpu.vector_store %arg5[%275, %c0_69], %274 {strides = array<i32>} : memref<64x128xf32, #tpu.memory_space<vmem>>, vector<8x128xf32>,
    %c8_i32_70 = arith.constant 8 : i32
    %c0_71 = arith.constant 0 : index
    %c0_72 = arith.constant 0 : index
    %277 = vector.load %arg7[%c0_71, %c0_72] : memref<8x128xf32, #tpu.memory_space<vmem>>, vector<8x128xf32>
    tpu.vector_store %arg7[%c0_71, %c0_72], %274 {strides = array<i32>} : memref<8x128xf32, #tpu.memory_space<vmem>>, vector<8x128xf32>,
    %c0_73 = arith.constant 0 : index
    %c0_74 = arith.constant 0 : index
    %278 = vector.load %arg8[%c0_73, %c0_74] : memref<8x128xf32, #tpu.memory_space<vmem>>, vector<8x128xf32>
    tpu.vector_store %arg8[%c0_73, %c0_74], %272 {strides = array<i32>} : memref<8x128xf32, #tpu.memory_space<vmem>>, vector<8x128xf32>,
    return
  }
  func.func @transform_0(%arg0: i32) -> (i32, i32) {
    %c0_i32 = arith.constant 0 : i32
    %c0_i32_0 = arith.constant 0 : i32
    return %arg0, %c0_i32 : i32, i32
  }
  func.func @transform_1(%arg0: i32) -> (i32, i32) {
    %c0_i32 = arith.constant 0 : i32
    %c0_i32_0 = arith.constant 0 : i32
    %c0_i32_1 = arith.constant 0 : i32
    return %c0_i32, %c0_i32_0 : i32, i32
  }
  func.func @transform_2(%arg0: i32) -> (i32, i32) {
    %c0_i32 = arith.constant 0 : i32
    %c0_i32_0 = arith.constant 0 : i32
    %c0_i32_1 = arith.constant 0 : i32
    return %c0_i32, %c0_i32_0 : i32, i32
  }
  func.func @transform_3(%arg0: i32) -> (i32, i32) {
    %c0_i32 = arith.constant 0 : i32
    %c0_i32_0 = arith.constant 0 : i32
    %c0_i32_1 = arith.constant 0 : i32
    return %c0_i32, %c0_i32_0 : i32, i32
  }
  func.func @transform_4(%arg0: i32) -> (i32, i32) {
    %c0_i32 = arith.constant 0 : i32
    %c0_i32_0 = arith.constant 0 : i32
    return %arg0, %c0_i32 : i32, i32
  }
}

</mosaic_0001>

<bundles_post_ra>
// kernel: tpu_custom_call.1
= control target key start
LH: loop header
LB: loop body
LE: loop exit
PB: predicated region body
PF: predicated region fallthrough
CT: control target
= control target key end

     0   :  { %9 = vsyncpa [#allocation6], 0  ;;  %s2952_s0 = inlined_call_operand.vmem [shape: f32[64,16], index: 0, kind: input, shape index: {}]   ;;  %s2953_s1 = inlined_call_operand.vmem [shape: f32[16,512], index: 1, kind: input, shape index: {}]   ;;  %s2954_s2 = inlined_call_operand.hbm [shape: f32[128,512], index: 2, kind: input, shape index: {}]   ;;  %s2955_s3 = inlined_call_operand.vmem [shape: f32[1,512], index: 3, kind: input, shape index: {}]   ;;  %s2956_s4 = inlined_call_operand.hbm [shape: f32[64,128], index: 4, kind: output, shape index: {}]  }
   0x1   :  { %10 = vsyncpa [#allocation7], 0  ;;  %s19_s17 = sshll.u32 %s2954_s2, 4  ;;  %s1935_s18 = smov [#allocation5]   ;;  %s20_s17 = int_to_ptr.hbm [resolvable:$true] %s19_s17 }
   0x2   :  { %s21_s19 = sshll.u32 %s1935_s18, 4  ;;  %s1936_s20 = smov 512   ;;  %s22_s19 = int_to_ptr.vmem [resolvable:$true] %s21_s19 }
   0x3   :  { %s1937_s21 = smov 32  }
   0x4   :  { %27 = dma.hbm_to_vmem [thread:$0]  %s20_s17, 8192, %s22_s19, [#allocation6], %s1936_s20, %s1936_s20, %s1937_s21  }
   0x5   :  { %1931 = dma.done.wait [#allocation6], 8192  }
   0x6   :  { %1932 = vsyncadd [#allocation6], 4294959104  ;;  %v52_v0 = vld [vmem:[%s2953_s1 + $0x20] sm:$0xff]  ;;  %v53_v1 = vld [vmem:[%s2953_s1 + $0x28] sm:$0xff]  ;;  %vm66_vm0 = vcmask 130048   ;;  %s1608_s29 = sshll.u32 %s2956_s4, 4  ;;  %s1609_s29 = int_to_ptr.hbm [resolvable:$true] %s1608_s29 }
   0x7   :  { %v54_v2 = vld [vmem:[%s2953_s1 + $0x30] sm:$0xff]  ;;  %105 = vmatpush.msra.mxu0 %v52_v0  ;;  %146 = vmatpush.msra.mxu1 %v53_v1  ;;  %v55_v3 = vld [vmem:[%s2953_s1 + $0x38] sm:$0xff]  ;;  %v48_v4 = vld [vmem:[%s2953_s1] sm:$0xff]  ;;  %s1940_s30 = smov 128   ;;  %s1941_s5 = smov 8  }
   0x8   :  { %v49_v5 = vld [vmem:[%s2953_s1 + $0x8] sm:$0xff]  ;;  %187 = vmatpush.msra.mxu2 %v54_v2  ;;  %228 = vmatpush.msra.mxu3 %v55_v3  ;;  %v50_v6 = vld [vmem:[%s2953_s1 + $0x10] sm:$0xff]  ;;  %v51_v7 = vld [vmem:[%s2953_s1 + $0x18] sm:$0xff] }
   0x9   :  { %v40_v8 = vld [vmem:[%s2952_s0] sm:$0xff]  ;;  %106 = vmatpush.msra.mxu0 %v48_v4  ;;  %147 = vmatpush.msra.mxu1 %v49_v5  ;;  %v1999_v10 = vld [vmem:[#allocation5 + $0x1e8] sm:$0xff]  ;;  %v2003_v11 = vld [vmem:[#allocation5 + $0x1f8] sm:$0xff] }
   0xa   :  { %188 = vmatpush.msra.mxu2 %v50_v6  ;;  %229 = vmatpush.msra.mxu3 %v51_v7  ;;  %v1997_v9 = vld [vmem:[#allocation5 + $0x1e0] sm:$0xff]  ;;  %v2009_v13 = vld [vmem:[#allocation5 + $0x1c8] sm:$0xff]  ;;  %v2013_v14 = vld [vmem:[#allocation5 + $0x1d8] sm:$0xff] }
   0xb   :  { %1628 = vmatmul.msk.f32.vlgmr.msra.gmra.mxu0 %vm66_vm0, %v40_v8  ;;  %1636 = vmatmul.msk.f32.vlgmr.msra.gmra.mxu1 %vm66_vm0, %v40_v8  ;;  %v2007_v12 = vld [vmem:[#allocation5 + $0x1c0] sm:$0xff]  ;;  %v2015_v15 = vld [vmem:[#allocation5 + $0x1f0] sm:$0xff]  ;;  %v2020_v17 = vld [vmem:[#allocation5 + $0x1a8] sm:$0xff] }
   0xc   :  { %1644 = vmatmul.msk.f32.vlgmr.msra.gmra.mxu2 %vm66_vm0, %v40_v8  ;;  %1652 = vmatmul.msk.f32.vlgmr.msra.gmra.mxu3 %vm66_vm0, %v40_v8  ;;  %v2018_v16 = vld [vmem:[#allocation5 + $0x1a0] sm:$0xff]  ;;  %v2023_v18 = vld [vmem:[#allocation5 + $0x1d0] sm:$0xff]  ;;  %v2027_v19 = vld [vmem:[#allocation5 + $0x1b8] sm:$0xff] }
   0xd   :  { %360 = vmatpush.msrb.mxu0 %v1997_v9  ;;  %380 = vmatpush.msrb.mxu1 %v1999_v10  ;;  %v41_v20 = vld [vmem:[%s2952_s0 + $0x8] sm:$0xff]  ;;  %v2034_v21 = vld [vmem:[#allocation5 + $0x1b0] sm:$0xff]  ;;  %v2038_v22 = vld [vmem:[#allocation5 + $0x180] sm:$0xff] }
   0xe   :  { %420 = vmatpush.msrb.mxu3 %v2003_v11  ;;  %400 = vmatpush.msrb.mxu2 %v2015_v15  ;;  %v2040_v23 = vld [vmem:[#allocation5 + $0x188] sm:$0xff]  ;;  %v2046_v24 = vld [vmem:[#allocation5 + $0x198] sm:$0xff]  ;;  %v2048_v25 = vld [vmem:[#allocation5 + $0x190] sm:$0xff] }
   0xf   :  { %361 = vmatpush.msrb.mxu0 %v2007_v12  ;;  %381 = vmatpush.msrb.mxu1 %v2009_v13  ;;  %v2052_v26 = vld [vmem:[#allocation5 + $0x160] sm:$0xff]  ;;  %v2054_v27 = vld [vmem:[#allocation5 + $0x168] sm:$0xff]  ;;  %v2058_v28 = vld [vmem:[#allocation5 + $0x178] sm:$0xff] }
  0x10   :  { %421 = vmatpush.msrb.mxu3 %v2013_v14  ;;  %401 = vmatpush.msrb.mxu2 %v2023_v18  ;;  %v2060_v29 = vld [vmem:[#allocation5 + $0x170] sm:$0xff]  ;;  %v2063_v30 = vld [vmem:[#allocation5 + $0x140] sm:$0xff]  ;;  %v2065_v31 = vld [vmem:[#allocation5 + $0x148] sm:$0xff] }
  0x11   :  { %362 = vmatpush.msrb.mxu0 %v2018_v16  ;;  %382 = vmatpush.msrb.mxu1 %v2020_v17  ;;  %v2070_v32 = vld [vmem:[#allocation5 + $0x158] sm:$0xff]  ;;  %v2072_v33 = vld [vmem:[#allocation5 + $0x150] sm:$0xff]  ;;  %v2081_v35 = vld [vmem:[#allocation5 + $0x120] sm:$0xff] }
  0x12   :  { %422 = vmatpush.msrb.mxu3 %v2027_v19  ;;  %402 = vmatpush.msrb.mxu2 %v2034_v21  ;;  %v42_v34 = vld [vmem:[%s2952_s0 + $0x10] sm:$0xff]  ;;  %v2083_v36 = vld [vmem:[#allocation5 + $0x128] sm:$0xff]  ;;  %v2089_v37 = vld [vmem:[#allocation5 + $0x138] sm:$0xff] }
  0x13   :  { %1629 = vmatmul.msk.f32.gmra.mxu0 %vm66_vm0, %v41_v20  ;;  %1637 = vmatmul.msk.f32.gmra.mxu1 %vm66_vm0, %v41_v20  ;;  %v2091_v38 = vld [vmem:[#allocation5 + $0x130] sm:$0xff]  ;;  %v2095_v39 = vld [vmem:[#allocation5 + $0x100] sm:$0xff]  ;;  %v2097_v40 = vld [vmem:[#allocation5 + $0x108] sm:$0xff] }
  0x14   :  { %1645 = vmatmul.msk.f32.gmra.mxu2 %vm66_vm0, %v41_v20  ;;  %1653 = vmatmul.msk.f32.gmra.mxu3 %vm66_vm0, %v41_v20  ;;  %v2101_v41 = vld [vmem:[#allocation5 + $0x118] sm:$0xff]  ;;  %v2103_v42 = vld [vmem:[#allocation5 + $0x110] sm:$0xff]  ;;  %v2106_v43 = vld [vmem:[#allocation5 + $0xe0] sm:$0xff] }
  0x15   :  { %363 = vmatpush.msrb.mxu0 %v2038_v22  ;;  %383 = vmatpush.msrb.mxu1 %v2040_v23  ;;  %v2108_v44 = vld [vmem:[#allocation5 + $0xe8] sm:$0xff]  ;;  %v2113_v45 = vld [vmem:[#allocation5 + $0xf8] sm:$0xff]  ;;  %v2115_v46 = vld [vmem:[#allocation5 + $0xf0] sm:$0xff] }
  0x16   :  { %423 = vmatpush.msrb.mxu3 %v2046_v24  ;;  %403 = vmatpush.msrb.mxu2 %v2048_v25  ;;  %v43_v47 = vld [vmem:[%s2952_s0 + $0x18] sm:$0xff]  ;;  %v2124_v48 = vld [vmem:[#allocation5 + $0xc0] sm:$0xff]  ;;  %v2126_v49 = vld [vmem:[#allocation5 + $0xc8] sm:$0xff] }
  0x17   :  { %364 = vmatpush.msrb.mxu0 %v2052_v26  ;;  %384 = vmatpush.msrb.mxu1 %v2054_v27  ;;  %v2132_v50 = vld [vmem:[#allocation5 + $0xd8] sm:$0xff]  ;;  %v2134_v51 = vld [vmem:[#allocation5 + $0xd0] sm:$0xff]  ;;  %v2138_v52 = vld [vmem:[#allocation5 + $0xa0] sm:$0xff] }
  0x18   :  { %424 = vmatpush.msrb.mxu3 %v2058_v28  ;;  %404 = vmatpush.msrb.mxu2 %v2060_v29  ;;  %3044 = vst [vmem:[#allocation11_spill] sm:$0xff] %v2132_v50  ;;  %v2140_v53 = vld [vmem:[#allocation5 + $0xa8] sm:$0xff]  ;;  %v2144_v54 = vld [vmem:[#allocation5 + $0xb8] sm:$0xff]  ;;  %v2146_v55 = vld [vmem:[#allocation5 + $0xb0] sm:$0xff] }
  0x19   :  { %365 = vmatpush.msrb.mxu0 %v2063_v30  ;;  %385 = vmatpush.msrb.mxu1 %v2065_v31  ;;  %3045 = vst [vmem:[#allocation12_spill] sm:$0xff] %v2134_v51  ;;  %v2149_v56 = vld [vmem:[#allocation5 + $0x80] sm:$0xff]  ;;  %v2151_v57 = vld [vmem:[#allocation5 + $0x88] sm:$0xff]  ;;  %v2156_v58 = vld [vmem:[#allocation5 + $0x98] sm:$0xff] }
  0x1a   :  { %425 = vmatpush.msrb.mxu3 %v2070_v32  ;;  %405 = vmatpush.msrb.mxu2 %v2072_v33  ;;  %3046 = vst [vmem:[#allocation13_spill] sm:$0xff] %v2138_v52  ;;  %v2158_v59 = vld [vmem:[#allocation5 + $0x90] sm:$0xff]  ;;  %v44_v60 = vld [vmem:[%s2952_s0 + $0x20] sm:$0xff]  ;;  %v2169_v62 = vld [vmem:[#allocation5 + $0x68] sm:$0xff] }
  0x1b   :  { %1630 = vmatmul.msk.f32.gmra.mxu0 %vm66_vm0, %v42_v34  ;;  %1638 = vmatmul.msk.f32.gmra.mxu1 %vm66_vm0, %v42_v34  ;;  %3047 = vst [vmem:[#allocation14_spill] sm:$0xff] %v2140_v53  ;;  %v2167_v61 = vld [vmem:[#allocation5 + $0x60] sm:$0xff]  ;;  %v2175_v63 = vld [vmem:[#allocation5 + $0x78] sm:$0xff]  ;;  %v2177_v0 = vld [vmem:[#allocation5 + $0x70] sm:$0xff] }
  0x1c   :  { %1646 = vmatmul.msk.f32.gmra.mxu2 %vm66_vm0, %v42_v34  ;;  %1654 = vmatmul.msk.f32.gmra.mxu3 %vm66_vm0, %v42_v34  ;;  %3048 = vst [vmem:[#allocation15_spill] sm:$0xff] %v2144_v54  ;;  %v2181_v1 = vld [vmem:[#allocation5 + $0x40] sm:$0xff]  ;;  %v2183_v2 = vld [vmem:[#allocation5 + $0x48] sm:$0xff]  ;;  %v2187_v3 = vld [vmem:[#allocation5 + $0x58] sm:$0xff] }
  0x1d   :  { %366 = vmatpush.msrb.mxu0 %v2081_v35  ;;  %386 = vmatpush.msrb.mxu1 %v2083_v36  ;;  %3049 = vst [vmem:[#allocation16_spill] sm:$0xff] %v2146_v55  ;;  %v2189_v4 = vld [vmem:[#allocation5 + $0x50] sm:$0xff]  ;;  %v2192_v5 = vld [vmem:[#allocation5 + $0x20] sm:$0xff]  ;;  %v2194_v6 = vld [vmem:[#allocation5 + $0x28] sm:$0xff] }
  0x1e   :  { %426 = vmatpush.msrb.mxu3 %v2089_v37  ;;  %406 = vmatpush.msrb.mxu2 %v2091_v38  ;;  %3050 = vst [vmem:[#allocation17_spill] sm:$0xff] %v2149_v56  ;;  %v2199_v7 = vld [vmem:[#allocation5 + $0x30] sm:$0xff]  ;;  %v2201_v8 = vld [vmem:[#allocation5 + $0x38] sm:$0xff]  ;;  %v45_v20 = vld [vmem:[%s2952_s0 + $0x28] sm:$0xff] }
  0x1f   :  { %367 = vmatpush.msrb.mxu0 %v2095_v39  ;;  %387 = vmatpush.msrb.mxu1 %v2097_v40  ;;  %3051 = vst [vmem:[#allocation18_spill] sm:$0xff] %v2151_v57  ;;  %v2210_v34 = vld [vmem:[#allocation5] sm:$0xff] }
  0x20   :  { %427 = vmatpush.msrb.mxu3 %v2101_v41  ;;  %407 = vmatpush.msrb.mxu2 %v2103_v42  ;;  %3052 = vst [vmem:[#allocation19_spill] sm:$0xff] %v2156_v58 }
  0x21   :  { %368 = vmatpush.msrb.mxu0 %v2106_v43  ;;  %388 = vmatpush.msrb.mxu1 %v2108_v44  ;;  %3053 = vst [vmem:[#allocation20_spill] sm:$0xff] %v2158_v59 }
  0x22   :  { %428 = vmatpush.msrb.mxu3 %v2113_v45  ;;  %408 = vmatpush.msrb.mxu2 %v2115_v46  ;;  %3054 = vst [vmem:[#allocation21_spill] sm:$0xff] %v2167_v61 }
  0x23   :  { %1631 = vmatmul.msk.f32.gmra.mxu0 %vm66_vm0, %v43_v47  ;;  %1639 = vmatmul.msk.f32.gmra.mxu1 %vm66_vm0, %v43_v47  ;;  %3055 = vst [vmem:[#allocation22_spill] sm:$0xff] %v2169_v62 }
  0x24   :  { %1647 = vmatmul.msk.f32.gmra.mxu2 %vm66_vm0, %v43_v47  ;;  %1655 = vmatmul.msk.f32.gmra.mxu3 %vm66_vm0, %v43_v47  ;;  %3056 = vst [vmem:[#allocation23_spill] sm:$0xff] %v2175_v63  ;;  %v2212_v47 = vld [vmem:[#allocation5 + $0x8] sm:$0xff] }
  0x25   :  { %369 = vmatpush.msrb.mxu0 %v2124_v48  ;;  %389 = vmatpush.msrb.mxu1 %v2126_v49  ;;  %3057 = vst [vmem:[#allocation24_spill] sm:$0xff] %v2177_v0 }
  0x26   :  { %429 = vmatpush.msrb.mxu3 %v2132_v50  ;;  %409 = vmatpush.msrb.mxu2 %v2134_v51  ;;  %3058 = vst [vmem:[#allocation25_spill] sm:$0xff] %v2181_v1 }
  0x27   :  { %370 = vmatpush.msrb.mxu0 %v2138_v52  ;;  %390 = vmatpush.msrb.mxu1 %v2140_v53  ;;  %3059 = vst [vmem:[#allocation26_spill] sm:$0xff] %v2183_v2 }
  0x28   :  { %430 = vmatpush.msrb.mxu3 %v2144_v54  ;;  %410 = vmatpush.msrb.mxu2 %v2146_v55  ;;  %3060 = vst [vmem:[#allocation27_spill] sm:$0xff] %v2187_v3 }
  0x29   :  { %371 = vmatpush.msrb.mxu0 %v2149_v56  ;;  %391 = vmatpush.msrb.mxu1 %v2151_v57  ;;  %3061 = vst [vmem:[#allocation28_spill] sm:$0xff] %v2189_v4 }
  0x2a   :  { %431 = vmatpush.msrb.mxu3 %v2156_v58  ;;  %411 = vmatpush.msrb.mxu2 %v2158_v59  ;;  %3062 = vst [vmem:[#allocation29_spill] sm:$0xff] %v2192_v5 }
  0x2b   :  { %1632 = vmatmul.msk.f32.gmra.mxu0 %vm66_vm0, %v44_v60  ;;  %1640 = vmatmul.msk.f32.gmra.mxu1 %vm66_vm0, %v44_v60  ;;  %3063 = vst [vmem:[#allocation30_spill] sm:$0xff] %v2194_v6 }
  0x2c   :  { %1648 = vmatmul.msk.f32.gmra.mxu2 %vm66_vm0, %v44_v60  ;;  %1656 = vmatmul.msk.f32.gmra.mxu3 %vm66_vm0, %v44_v60  ;;  %3064 = vst [vmem:[#allocation31_spill] sm:$0xff] %v2199_v7  ;;  %v2218_v60 = vld [vmem:[#allocation5 + $0x10] sm:$0xff] }
  0x2d   :  { %372 = vmatpush.msrb.mxu0 %v2167_v61  ;;  %392 = vmatpush.msrb.mxu1 %v2169_v62  ;;  %3065 = vst [vmem:[#allocation32_spill] sm:$0xff] %v2201_v8 }
  0x2e   :  { %432 = vmatpush.msrb.mxu3 %v2175_v63  ;;  %412 = vmatpush.msrb.mxu2 %v2177_v0  ;;  %3066 = vst [vmem:[#allocation33_spill] sm:$0xff] %v2210_v34 }
  0x2f   :  { %373 = vmatpush.msrb.mxu0 %v2181_v1  ;;  %393 = vmatpush.msrb.mxu1 %v2183_v2  ;;  %3067 = vst [vmem:[#allocation34_spill] sm:$0xff] %v2212_v47 }
  0x30   :  { %433 = vmatpush.msrb.mxu3 %v2187_v3  ;;  %413 = vmatpush.msrb.mxu2 %v2189_v4  ;;  %3068 = vst [vmem:[#allocation35_spill] sm:$0xff] %v2218_v60  ;;  %v2220_v3 = vld [vmem:[#allocation5 + $0x18] sm:$0xff] }
  0x31   :  { %374 = vmatpush.msrb.mxu0 %v2192_v5  ;;  %394 = vmatpush.msrb.mxu1 %v2194_v6  ;;  %3069 = vst [vmem:[#allocation36_spill] sm:$0xff] %v2220_v3 }
  0x32   :  { %414 = vmatpush.msrb.mxu2 %v2199_v7  ;;  %434 = vmatpush.msrb.mxu3 %v2201_v8  ;;  %v46_v8 = vld [vmem:[%s2952_s0 + $0x30] sm:$0xff] }
  0x33   :  { %1633 = vmatmul.msk.f32.gmra.mxu0 %vm66_vm0, %v45_v20  ;;  %1641 = vmatmul.msk.f32.gmra.mxu1 %vm66_vm0, %v45_v20 }
  0x34   :  { %1649 = vmatmul.msk.f32.gmra.mxu2 %vm66_vm0, %v45_v20  ;;  %1657 = vmatmul.msk.f32.gmra.mxu3 %vm66_vm0, %v45_v20  ;;  %v47_v20 = vld [vmem:[%s2952_s0 + $0x38] sm:$0xff] }
  0x35   :  { %375 = vmatpush.msrb.mxu0 %v2210_v34  ;;  %395 = vmatpush.msrb.mxu1 %v2212_v47 }
  0x36   :  { %415 = vmatpush.msrb.mxu2 %v2218_v60  ;;  %435 = vmatpush.msrb.mxu3 %v2220_v3 }
  0x37   :  { %515 = vmatpush.msra.mxu0 %v1997_v9  ;;  %535 = vmatpush.msra.mxu1 %v1999_v10 }
  0x38   :  { %555 = vmatpush.msra.mxu2 %v2015_v15  ;;  %575 = vmatpush.msra.mxu3 %v2003_v11 }
  0x39   :  { %516 = vmatpush.msra.mxu0 %v2007_v12  ;;  %536 = vmatpush.msra.mxu1 %v2009_v13 }
  0x3a   :  { %556 = vmatpush.msra.mxu2 %v2023_v18  ;;  %576 = vmatpush.msra.mxu3 %v2013_v14 }
  0x3b   :  { %1634 = vmatmul.msk.f32.gmra.mxu0 %vm66_vm0, %v46_v8  ;;  %1642 = vmatmul.msk.f32.gmra.mxu1 %vm66_vm0, %v46_v8 }
  0x3c   :  { %1650 = vmatmul.msk.f32.gmra.mxu2 %vm66_vm0, %v46_v8  ;;  %1658 = vmatmul.msk.f32.gmra.mxu3 %vm66_vm0, %v46_v8  ;;  %v1938_v8 = vmov 0.0  }
  0x3d   :  { %517 = vmatpush.msra.mxu0 %v2018_v16  ;;  %537 = vmatpush.msra.mxu1 %v2020_v17 }
  0x3e   :  { %557 = vmatpush.msra.mxu2 %v2034_v21  ;;  %577 = vmatpush.msra.mxu3 %v2027_v19 }
  0x3f   :  { %518 = vmatpush.msra.mxu0 %v2038_v22  ;;  %538 = vmatpush.msra.mxu1 %v2040_v23 }
  0x40   :  { %558 = vmatpush.msra.mxu2 %v2048_v25  ;;  %578 = vmatpush.msra.mxu3 %v2046_v24 }
  0x41   :  { %519 = vmatpush.msra.mxu0 %v2052_v26  ;;  %539 = vmatpush.msra.mxu1 %v2054_v27 }
  0x42   :  { %559 = vmatpush.msra.mxu2 %v2060_v29  ;;  %579 = vmatpush.msra.mxu3 %v2058_v28 }
  0x43   :  { %1635 = vmatmul.msk.f32.gmra.mxu0 %vm66_vm0, %v47_v20  ;;  %1643 = vmatmul.msk.f32.gmra.mxu1 %vm66_vm0, %v47_v20 }
  0x44   :  { %1651 = vmatmul.msk.f32.gmra.mxu2 %vm66_vm0, %v47_v20  ;;  %1659 = vmatmul.msk.f32.gmra.mxu3 %vm66_vm0, %v47_v20  ;;  %v3070_v20 = vld [vmem:[#allocation27_spill] sm:$0xff] }
  0x45   :  { %520 = vmatpush.msra.mxu0 %v2063_v30  ;;  %540 = vmatpush.msra.mxu1 %v2065_v31 }
  0x46   :  { %560 = vmatpush.msra.mxu2 %v2072_v33  ;;  %580 = vmatpush.msra.mxu3 %v2070_v32 }
  0x47   :  { %521 = vmatpush.msra.mxu0 %v2081_v35  ;;  %541 = vmatpush.msra.mxu1 %v2083_v36 }
  0x48   :  { %561 = vmatpush.msra.mxu2 %v2091_v38  ;;  %581 = vmatpush.msra.mxu3 %v2089_v37 }
  0x49   :  { %522 = vmatpush.msra.mxu0 %v2095_v39  ;;  %542 = vmatpush.msra.mxu1 %v2097_v40 }
  0x4a   :  { %562 = vmatpush.msra.mxu2 %v2103_v42  ;;  %582 = vmatpush.msra.mxu3 %v2101_v41 }
  0x4b   :  { %376 = vmatmul.f32.vlgmr.msrb.gmra.mxu0 %v1938_v8  ;;  %396 = vmatmul.f32.vlgmr.msrb.gmra.mxu1 %v1938_v8 }
  0x4c   :  { %416 = vmatmul.f32.vlgmr.msrb.gmra.mxu2 %v1938_v8  ;;  %436 = vmatmul.f32.vlgmr.msrb.gmra.mxu3 %v1938_v8  ;;  %v3071_v8 = vld [vmem:[#allocation32_spill] sm:$0xff] }
  0x4d   :  { %523 = vmatpush.msra.mxu0 %v2106_v43  ;;  %543 = vmatpush.msra.mxu1 %v2108_v44 }
  0x4e   :  { %563 = vmatpush.msra.mxu2 %v2115_v46  ;;  %583 = vmatpush.msra.mxu3 %v2113_v45 }
  0x4f   :  { %524 = vmatpush.msra.mxu0 %v2124_v48  ;;  %544 = vmatpush.msra.mxu1 %v2126_v49 }
  0x50   :  { %564 = vmatpush.msra.mxu2 %v2134_v51  ;;  %584 = vmatpush.msra.mxu3 %v2132_v50 }
  0x51   :  { %525 = vmatpush.msra.mxu0 %v2138_v52  ;;  %545 = vmatpush.msra.mxu1 %v2140_v53 }
  0x52   :  { %565 = vmatpush.msra.mxu2 %v2146_v55  ;;  %585 = vmatpush.msra.mxu3 %v2144_v54 }
  0x53   :  { %526 = vmatpush.msra.mxu0 %v2149_v56  ;;  %546 = vmatpush.msra.mxu1 %v2151_v57 }
  0x54   :  { %566 = vmatpush.msra.mxu2 %v2158_v59  ;;  %586 = vmatpush.msra.mxu3 %v2156_v58 }
  0x55   :  { %527 = vmatpush.msra.mxu0 %v2167_v61  ;;  %547 = vmatpush.msra.mxu1 %v2169_v62 }
  0x56   :  { %567 = vmatpush.msra.mxu2 %v2177_v0  ;;  %587 = vmatpush.msra.mxu3 %v2175_v63 }
  0x57   :  { %528 = vmatpush.msra.mxu0 %v2181_v1  ;;  %548 = vmatpush.msra.mxu1 %v2183_v2 }
  0x58   :  { %568 = vmatpush.msra.mxu2 %v2189_v4  ;;  %588 = vmatpush.msra.mxu3 %v3070_v20 }
  0x59   :  { %529 = vmatpush.msra.mxu0 %v2192_v5  ;;  %549 = vmatpush.msra.mxu1 %v2194_v6 }
  0x5a   :  { %569 = vmatpush.msra.mxu2 %v2199_v7  ;;  %589 = vmatpush.msra.mxu3 %v3071_v8 }
  0x5b   :  { %530 = vmatpush.msra.mxu0 %v2210_v34  ;;  %550 = vmatpush.msra.mxu1 %v2212_v47 }
  0x5c   :  { %570 = vmatpush.msra.mxu2 %v2218_v60  ;;  %590 = vmatpush.msra.mxu3 %v2220_v3 }
  0x5d   :  { %671 = vmatpush.msrb.mxu0 %v1997_v9  ;;  %691 = vmatpush.msrb.mxu1 %v1999_v10 }
  0x5e   :  { %711 = vmatpush.msrb.mxu2 %v2015_v15  ;;  %731 = vmatpush.msrb.mxu3 %v2003_v11 }
  0x5f   :  { %672 = vmatpush.msrb.mxu0 %v2007_v12  ;;  %692 = vmatpush.msrb.mxu1 %v2009_v13 }
  0x60   :  { %712 = vmatpush.msrb.mxu2 %v2023_v18  ;;  %732 = vmatpush.msrb.mxu3 %v2013_v14 }
  0x61   :  { %673 = vmatpush.msrb.mxu0 %v2018_v16  ;;  %693 = vmatpush.msrb.mxu1 %v2020_v17 }
  0x62   :  { %713 = vmatpush.msrb.mxu2 %v2034_v21  ;;  %733 = vmatpush.msrb.mxu3 %v2027_v19 }
  0x63   :  { %674 = vmatpush.msrb.mxu0 %v2038_v22  ;;  %694 = vmatpush.msrb.mxu1 %v2040_v23 }
  0x64   :  { %714 = vmatpush.msrb.mxu2 %v2048_v25  ;;  %734 = vmatpush.msrb.mxu3 %v2046_v24 }
  0x65   :  { %675 = vmatpush.msrb.mxu0 %v2052_v26  ;;  %695 = vmatpush.msrb.mxu1 %v2054_v27 }
  0x66   :  { %715 = vmatpush.msrb.mxu2 %v2060_v29  ;;  %735 = vmatpush.msrb.mxu3 %v2058_v28 }
  0x67   :  { %676 = vmatpush.msrb.mxu0 %v2063_v30  ;;  %696 = vmatpush.msrb.mxu1 %v2065_v31 }
  0x68   :  { %716 = vmatpush.msrb.mxu2 %v2072_v33  ;;  %736 = vmatpush.msrb.mxu3 %v2070_v32 }
  0x69   :  { %677 = vmatpush.msrb.mxu0 %v2081_v35  ;;  %697 = vmatpush.msrb.mxu1 %v2083_v36 }
  0x6a   :  { %717 = vmatpush.msrb.mxu2 %v2091_v38  ;;  %737 = vmatpush.msrb.mxu3 %v2089_v37 }
  0x6b   :  { %678 = vmatpush.msrb.mxu0 %v2095_v39  ;;  %698 = vmatpush.msrb.mxu1 %v2097_v40 }
  0x6c   :  { %718 = vmatpush.msrb.mxu2 %v2103_v42  ;;  %738 = vmatpush.msrb.mxu3 %v2101_v41 }
  0x6d   :  { %679 = vmatpush.msrb.mxu0 %v2106_v43  ;;  %699 = vmatpush.msrb.mxu1 %v2108_v44 }
  0x6e   :  { %719 = vmatpush.msrb.mxu2 %v2115_v46  ;;  %739 = vmatpush.msrb.mxu3 %v2113_v45 }
  0x6f   :  { %680 = vmatpush.msrb.mxu0 %v2124_v48  ;;  %700 = vmatpush.msrb.mxu1 %v2126_v49 }
  0x70   :  { %720 = vmatpush.msrb.mxu2 %v2134_v51  ;;  %740 = vmatpush.msrb.mxu3 %v2132_v50 }
  0x71   :  { %681 = vmatpush.msrb.mxu0 %v2138_v52  ;;  %701 = vmatpush.msrb.mxu1 %v2140_v53 }
  0x72   :  { %721 = vmatpush.msrb.mxu2 %v2146_v55  ;;  %741 = vmatpush.msrb.mxu3 %v2144_v54 }
  0x73   :  { %682 = vmatpush.msrb.mxu0 %v2149_v56  ;;  %702 = vmatpush.msrb.mxu1 %v2151_v57 }
  0x74   :  { %722 = vmatpush.msrb.mxu2 %v2158_v59  ;;  %742 = vmatpush.msrb.mxu3 %v2156_v58 }
  0x75   :  { %683 = vmatpush.msrb.mxu0 %v2167_v61  ;;  %703 = vmatpush.msrb.mxu1 %v2169_v62 }
  0x76   :  { %723 = vmatpush.msrb.mxu2 %v2177_v0  ;;  %743 = vmatpush.msrb.mxu3 %v2175_v63 }
  0x77   :  { %684 = vmatpush.msrb.mxu0 %v2181_v1  ;;  %704 = vmatpush.msrb.mxu1 %v2183_v2 }
  0x78   :  { %724 = vmatpush.msrb.mxu2 %v2189_v4  ;;  %744 = vmatpush.msrb.mxu3 %v3070_v20 }
  0x79   :  { %685 = vmatpush.msrb.mxu0 %v2192_v5  ;;  %705 = vmatpush.msrb.mxu1 %v2194_v6  ;;  %v56_v5 = vld [vmem:[%s2955_s3] sm:$0xf]  ;;  %s1939_s3 = smov [#allocation8]  }
  0x7a   :  { %725 = vmatpush.msrb.mxu2 %v2199_v7  ;;  %745 = vmatpush.msrb.mxu3 %v3071_v8  ;;  %v58_v20 = vperm.slane %v56_v5, 0  ;;  %v59_v6 = vperm.slane %v56_v5, 1  ;;  %s1606_s27 = sshll.u32 %s1939_s3, 4  ;;  %s1607_s27 = int_to_ptr.vmem [resolvable:$true] %s1606_s27 }
  0x7b   :  { %686 = vmatpush.msrb.mxu0 %v2210_v34  ;;  %706 = vmatpush.msrb.mxu1 %v2212_v47 }
  0x7c   :  { %726 = vmatpush.msrb.mxu2 %v2218_v60  ;;  %746 = vmatpush.msrb.mxu3 %v2220_v3  ;;  %v2381_v60 = vperm.slane %v56_v5, 2  ;;  %v61_v3 = vperm.slane %v56_v5, 3 }
  0x88   :  { %v108_v2 = vpop.f32.mrf.mxu0  ;;  %v149_v4 = vpop.f32.mrf.mxu1 }
  0x8f   :  { %v2373_v1 = vpop.f32.mrf.mxu2  ;;  %v2375_v7 = vpop.f32.mrf.mxu3 }
  0x90   :  { %v111_v8 = vpop.f32.mrf.mxu0  ;;  %v152_v34 = vpop.f32.mrf.mxu1 }
  0x91   :  { %v2377_v63 = vadd.f32 %v111_v8, %v58_v20  ;;  %v2379_v47 = vadd.f32 %v152_v34, %v59_v6 }
  0x93   :  { %3072 = vst [vmem:[#allocation37_spill] sm:$0xff] %v2377_v63 }
  0x94   :  { %3073 = vst [vmem:[#allocation38_spill] sm:$0xff] %v2379_v47 }
  0x97   :  { %v193_v0 = vpop.f32.mrf.mxu2  ;;  %v234_v62 = vpop.f32.mrf.mxu3 }
  0x98   :  { %v2384_v61 = vadd.f32 %v193_v0, %v2381_v60  ;;  %v2386_v58 = vadd.f32 %v234_v62, %v61_v3  ;;  %v114_v59 = vpop.f32.mrf.mxu0  ;;  %v155_v57 = vpop.f32.mrf.mxu1 }
  0x99   :  { %v2388_v56 = vadd.f32 %v114_v59, %v58_v20  ;;  %v2390_v54 = vadd.f32 %v155_v57, %v59_v6 }
  0x9a   :  { %3074 = vst [vmem:[#allocation39_spill] sm:$0xff] %v2384_v61 }
  0x9b   :  { %3075 = vst [vmem:[#allocation40_spill] sm:$0xff] %v2386_v58 }
  0x9c   :  { %3076 = vst [vmem:[#allocation41_spill] sm:$0xff] %v2388_v56 }
  0x9d   :  { %3077 = vst [vmem:[#allocation42_spill] sm:$0xff] %v2390_v54 }
  0x9f   :  { %v196_v8 = vpop.f32.mrf.mxu2  ;;  %v237_v63 = vpop.f32.mrf.mxu3 }
  0xa0   :  { %v2393_v34 = vadd.f32 %v196_v8, %v2381_v60  ;;  %v2395_v47 = vadd.f32 %v237_v63, %v61_v3  ;;  %v117_v5 = vpop.f32.mrf.mxu0  ;;  %v158_v55 = vpop.f32.mrf.mxu1 }
  0xa1   :  { %v2397_v53 = vadd.f32 %v117_v5, %v58_v20  ;;  %v2399_v0 = vadd.f32 %v158_v55, %v59_v6 }
  0xa2   :  { %3078 = vst [vmem:[#allocation43_spill] sm:$0xff] %v2393_v34 }
  0xa3   :  { %3079 = vst [vmem:[#allocation44_spill] sm:$0xff] %v2395_v47 }
  0xa4   :  { %3080 = vst [vmem:[#allocation45_spill] sm:$0xff] %v2397_v53 }
  0xa5   :  { %3081 = vst [vmem:[#allocation46_spill] sm:$0xff] %v2399_v0 }
  0xa7   :  { %v199_v62 = vpop.f32.mrf.mxu2  ;;  %v240_v61 = vpop.f32.mrf.mxu3 }
  0xa8   :  { %v2402_v59 = vadd.f32 %v199_v62, %v2381_v60  ;;  %v2404_v57 = vadd.f32 %v240_v61, %v61_v3  ;;  %v120_v54 = vpop.f32.mrf.mxu0  ;;  %v161_v56 = vpop.f32.mrf.mxu1 }
  0xa9   :  { %v2406_v58 = vadd.f32 %v120_v54, %v58_v20  ;;  %v2408_v8 = vadd.f32 %v161_v56, %v59_v6 }
  0xaa   :  { %3082 = vst [vmem:[#allocation47_spill] sm:$0xff] %v2402_v59 }
  0xab   :  { %3083 = vst [vmem:[#allocation48_spill] sm:$0xff] %v2404_v57 }
  0xac   :  { %3084 = vst [vmem:[#allocation49_spill] sm:$0xff] %v2406_v58 }
  0xad   :  { %3085 = vst [vmem:[#allocation50_spill] sm:$0xff] %v2408_v8 }
  0xaf   :  { %v202_v63 = vpop.f32.mrf.mxu2  ;;  %v243_v34 = vpop.f32.mrf.mxu3 }
  0xb0   :  { %v2411_v5 = vadd.f32 %v202_v63, %v2381_v60  ;;  %v2413_v55 = vadd.f32 %v243_v34, %v61_v3  ;;  %v123_v0 = vpop.f32.mrf.mxu0  ;;  %v164_v53 = vpop.f32.mrf.mxu1 }
  0xb1   :  { %v2415_v47 = vadd.f32 %v123_v0, %v58_v20  ;;  %v2417_v62 = vadd.f32 %v164_v53, %v59_v6 }
  0xb2   :  { %3086 = vst [vmem:[#allocation51_spill] sm:$0xff] %v2411_v5 }
  0xb3   :  { %3087 = vst [vmem:[#allocation52_spill] sm:$0xff] %v2413_v55 }
  0xb4   :  { %3088 = vst [vmem:[#allocation53_spill] sm:$0xff] %v2415_v47 }
  0xb5   :  { %3089 = vst [vmem:[#allocation54_spill] sm:$0xff] %v2417_v62 }
  0xb7   :  { %v205_v61 = vpop.f32.mrf.mxu2  ;;  %v246_v59 = vpop.f32.mrf.mxu3 }
  0xb8   :  { %v2420_v54 = vadd.f32 %v205_v61, %v2381_v60  ;;  %v2422_v56 = vadd.f32 %v246_v59, %v61_v3  ;;  %v126_v8 = vpop.f32.mrf.mxu0  ;;  %v167_v58 = vpop.f32.mrf.mxu1  ;;  %v109_v59 = vadd.f32 %v108_v2, %v58_v20 }
  0xb9   :  { %v2424_v57 = vadd.f32 %v126_v8, %v58_v20  ;;  %v2426_v63 = vadd.f32 %v167_v58, %v59_v6 }
  0xba   :  { %3090 = vst [vmem:[#allocation55_spill] sm:$0xff] %v2420_v54  ;;  %v150_v54 = vadd.f32 %v149_v4, %v59_v6 }
  0xbb   :  { %3091 = vst [vmem:[#allocation56_spill] sm:$0xff] %v2422_v56 }
  0xbc   :  { %3092 = vst [vmem:[#allocation57_spill] sm:$0xff] %v2424_v57 }
  0xbd   :  { %3093 = vst [vmem:[#allocation58_spill] sm:$0xff] %v2426_v63 }
  0xbf   :  { %v208_v34 = vpop.f32.mrf.mxu2  ;;  %v249_v5 = vpop.f32.mrf.mxu3 }
  0xc0   :  { %v2429_v0 = vadd.f32 %v208_v34, %v2381_v60  ;;  %v2431_v53 = vadd.f32 %v249_v5, %v61_v3  ;;  %v129_v62 = vpop.f32.mrf.mxu0  ;;  %v170_v47 = vpop.f32.mrf.mxu1 }
  0xc1   :  { %v2433_v55 = vadd.f32 %v129_v62, %v58_v20  ;;  %v2435_v61 = vadd.f32 %v170_v47, %v59_v6  ;;  %v232_v62 = vadd.f32 %v2375_v7, %v61_v3 }
  0xc2   :  { %3094 = vst [vmem:[#allocation59_spill] sm:$0xff] %v2429_v0 }
  0xc3   :  { %3095 = vst [vmem:[#allocation60_spill] sm:$0xff] %v2431_v53 }
  0xc4   :  { %3096 = vst [vmem:[#allocation61_spill] sm:$0xff] %v2433_v55 }
  0xc5   :  { %3097 = vst [vmem:[#allocation62_spill] sm:$0xff] %v2435_v61 }
  0xc7   :  { %v211_v56 = vpop.f32.mrf.mxu2  ;;  %v252_v8 = vpop.f32.mrf.mxu3 }
  0xc8   :  { %v2438_v58 = vadd.f32 %v211_v56, %v2381_v60  ;;  %v2440_v63 = vadd.f32 %v252_v8, %v61_v3  ;;  %v377_v57 = vpop.f32.mrf.mxu0  ;;  %v397_v34 = vpop.f32.mrf.mxu1 }
  0xc9   :  { %v440_v0 = vadd.f32 %v377_v57, %v109_v59  ;;  %v441_v5 = vadd.f32 %v397_v34, %v150_v54  ;;  %v191_v57 = vadd.f32 %v2373_v1, %v2381_v60 }
  0xca   :  { %3098 = vst [vmem:[#allocation63_spill] sm:$0xff] %v2438_v58 }
  0xcb   :  { %3099 = vst [vmem:[#allocation64_spill] sm:$0xff] %v2440_v63  ;;  %v1660_v53 = vmul.f32 -1.442695, %v440_v0  ;;  %v1661_v52 = vmul.f32 -1.442695, %v441_v5 }
  0xcd   :  { %1691 = vpow2.f32 %v1660_v53 }
  0xce   :  { %1693 = vpow2.f32 %v1661_v52 }
  0xcf   :  { %v437_v47 = vpop.f32.mrf.mxu3  ;;  %v417_v8 = vpop.f32.mrf.mxu2 }
  0xd0   :  { %v443_v2 = vadd.f32 %v437_v47, %v232_v62  ;;  %v442_v53 = vadd.f32 %v417_v8, %v191_v57 }
  0xd2   :  { %v1662_v4 = vmul.f32 -1.442695, %v443_v2 }
  0xd3   :  { %v1692_v6 = vpop.eup %1691 }
  0xd4   :  { %v1694_v20 = vpop.eup %1693  ;;  %v447_v61 = vadd.f32 1.0, %v1692_v6  ;;  %1695 = vpow2.f32 %v1662_v4 }
  0xd5   :  { %v466_v56 = vadd.f32 1.0, %v1694_v20 }
  0xd6   :  { %1697 = vrcp.f32 %v447_v61  ;;  %v459_v5 = vand.u32 2147483648, %v447_v61  ;;  %v457_v2 = vand.u32 2147483647, %v447_v61  ;;  %vm453_vm3 = vweird.f32 %v447_v61 }
  0xd7   :  { %1699 = vrcp.f32 %v466_v56  ;;  %v478_v62 = vand.u32 2147483648, %v466_v56  ;;  %v476_v6 = vand.u32 2147483647, %v466_v56  ;;  %vm472_vm4 = vweird.f32 %v466_v56 }
  0xd8   :  { %v460_v60 = vor.u32 1.1754944e-38, %v459_v5  ;;  %vm458_vm6 = vcmp.eq.f32.partialorder %v457_v2, 8.507059e+37 }
  0xd9   :  { %v479_v57 = vor.u32 1.1754944e-38, %v478_v62  ;;  %vm477_vm8 = vcmp.eq.f32.partialorder %v476_v6, 8.507059e+37 }
  0xda   :  { %v1696_v58 = vpop.eup %1695 }
  0xdb   :  { %v486_v54 = vadd.f32 1.0, %v1696_v58 }
  0xdc   :  { %v1698_v0 = vpop.eup %1697 }
  0xdd   :  { %v1700_v3 = vpop.eup %1699  ;;  %v449_v52 = vmul.f32 %v1698_v0, %v447_v61  ;;  %1701 = vrcp.f32 %v486_v54  ;;  %vm454_vm1 = vweird.f32 %v1698_v0  ;;  %vm492_vm10 = vweird.f32 %v486_v54 }
  0xde   :  { %v468_v7 = vmul.f32 %v1700_v3, %v466_v56  ;;  %1703 = vtanh.f32 %v442_v53  ;;  %vm473_vm2 = vweird.f32 %v1700_v3  ;;  %vm455_vm5 = vmor %vm453_vm3, %vm454_vm1  ;;  %v498_v56 = vand.u32 2147483648, %v486_v54 }
  0xdf   :  { %v450_v59 = vsub.f32 1.0, %v449_v52  ;;  %vm474_vm7 = vmor %vm472_vm4, %vm473_vm2 }
  0xe0   :  { %v469_v34 = vsub.f32 1.0, %v468_v7  ;;  %v499_v62 = vor.u32 1.1754944e-38, %v498_v56 }
  0xe1   :  { %v451_v47 = vmul.f32 %v1698_v0, %v450_v59 }
  0xe2   :  { %v470_v4 = vmul.f32 %v1700_v3, %v469_v34 }
  0xe3   :  { %v1702_v20 = vpop.eup %1701  ;;  %v452_v1 = vadd.f32 %v1698_v0, %v451_v47 }
  0xe4   :  { %v471_v58 = vadd.f32 %v1700_v3, %v470_v4  ;;  %v488_v8 = vmul.f32 %v1702_v20, %v486_v54  ;;  %v1704_v53 = vpop.eup %1703  ;;  %vm493_vm9 = vweird.f32 %v1702_v20 }
  0xe5   :  { %v456_v52 = vsel %vm455_vm5, %v1698_v0, %v452_v1  ;;  %v496_v0 = vand.u32 2147483647, %v486_v54  ;;  %vm494_vm11 = vmor %vm492_vm10, %vm493_vm9 }
  0xe6   :  { %v461_v7 = vsel %vm458_vm6, %v460_v60, %v456_v52  ;;  %v475_v59 = vsel %vm474_vm7, %v1700_v3, %v471_v58  ;;  %v489_v63 = vsub.f32 1.0, %v488_v8  ;;  %v3129_v60 = vld [vmem:[#allocation39_spill] sm:$0xff] }
  0xe7   :  { %v480_v34 = vsel %vm477_vm8, %v479_v57, %v475_v59  ;;  %v503_v55 = vmul.f32 %v1704_v53, %v461_v7  ;;  %vm497_vm12 = vcmp.eq.f32.partialorder %v496_v0, 8.507059e+37 }
  0xe8   :  { %v502_v50 = vmul.f32 0.0, %v480_v34  ;;  %v490_v51 = vmul.f32 %v1702_v20, %v489_v63 }
  0xea   :  { %v2445_v47 = vadd.f32 %v503_v55, %v502_v50  ;;  %v491_v61 = vadd.f32 %v1702_v20, %v490_v51 }
  0xec   :  { %1705 = vtanh.f32 %v2445_v47  ;;  %v495_v5 = vsel %vm494_vm11, %v1702_v20, %v491_v61 }
  0xed   :  { %v500_v2 = vsel %vm497_vm12, %v499_v62, %v495_v5 }
  0xf2   :  { %v1706_v3 = vpop.eup %1705 }
  0xf3   :  { %v506_v4 = vmul.f32 %v1706_v3, %v500_v2 }
  0xf5   :  { %507 = vst [vmem:[#allocation8] sm:$0xff] %v506_v4  ;;  %531 = vmatmul.f32.vlgmr.msra.gmra.mxu0 %v506_v4  ;;  %551 = vmatmul.f32.vlgmr.msra.gmra.mxu1 %v506_v4 }
  0xf6   :  { %571 = vmatmul.f32.vlgmr.msra.gmra.mxu2 %v506_v4  ;;  %591 = vmatmul.f32.vlgmr.msra.gmra.mxu3 %v506_v4 }
  0xf7   :  { %827 = vmatpush.msra.mxu0 %v1997_v9  ;;  %847 = vmatpush.msra.mxu1 %v1999_v10  ;;  %v3100_v9 = vld [vmem:[#allocation12_spill] sm:$0xff]  ;;  %v3101_v10 = vld [vmem:[#allocation11_spill] sm:$0xff] }
  0xf8   :  { %867 = vmatpush.msra.mxu2 %v2015_v15  ;;  %887 = vmatpush.msra.mxu3 %v2003_v11  ;;  %v3102_v11 = vld [vmem:[#allocation13_spill] sm:$0xff] }
  0xf9   :  { %828 = vmatpush.msra.mxu0 %v2007_v12  ;;  %848 = vmatpush.msra.mxu1 %v2009_v13  ;;  %v3103_v12 = vld [vmem:[#allocation14_spill] sm:$0xff]  ;;  %v3104_v13 = vld [vmem:[#allocation16_spill] sm:$0xff]  ;;  %v3106_v15 = vld [vmem:[#allocation17_spill] sm:$0xff] }
  0xfa   :  { %868 = vmatpush.msra.mxu2 %v2023_v18  ;;  %888 = vmatpush.msra.mxu3 %v2013_v14  ;;  %v3105_v14 = vld [vmem:[#allocation15_spill] sm:$0xff] }
  0xfb   :  { %829 = vmatpush.msra.mxu0 %v2018_v16  ;;  %849 = vmatpush.msra.mxu1 %v2020_v17  ;;  %v3107_v16 = vld [vmem:[#allocation18_spill] sm:$0xff]  ;;  %v3108_v17 = vld [vmem:[#allocation20_spill] sm:$0xff]  ;;  %v3109_v18 = vld [vmem:[#allocation19_spill] sm:$0xff] }
  0xfc   :  { %869 = vmatpush.msra.mxu2 %v2034_v21  ;;  %889 = vmatpush.msra.mxu3 %v2027_v19  ;;  %v3110_v19 = vld [vmem:[#allocation21_spill] sm:$0xff]  ;;  %v3111_v21 = vld [vmem:[#allocation22_spill] sm:$0xff] }
  0xfd   :  { %830 = vmatpush.msra.mxu0 %v2038_v22  ;;  %850 = vmatpush.msra.mxu1 %v2040_v23  ;;  %v3112_v22 = vld [vmem:[#allocation24_spill] sm:$0xff]  ;;  %v3113_v23 = vld [vmem:[#allocation23_spill] sm:$0xff] }
  0xfe   :  { %870 = vmatpush.msra.mxu2 %v2048_v25  ;;  %890 = vmatpush.msra.mxu3 %v2046_v24  ;;  %v3114_v24 = vld [vmem:[#allocation25_spill] sm:$0xff]  ;;  %v3115_v25 = vld [vmem:[#allocation26_spill] sm:$0xff] }
  0xff   :  { %831 = vmatpush.msra.mxu0 %v2052_v26  ;;  %851 = vmatpush.msra.mxu1 %v2054_v27  ;;  %v3116_v26 = vld [vmem:[#allocation28_spill] sm:$0xff]  ;;  %v3117_v27 = vld [vmem:[#allocation27_spill] sm:$0xff] }
 0x100   :  { %871 = vmatpush.msra.mxu2 %v2060_v29  ;;  %891 = vmatpush.msra.mxu3 %v2058_v28  ;;  %v3118_v28 = vld [vmem:[#allocation29_spill] sm:$0xff]  ;;  %v3119_v29 = vld [vmem:[#allocation30_spill] sm:$0xff] }
 0x101   :  { %832 = vmatpush.msra.mxu0 %v2063_v30  ;;  %852 = vmatpush.msra.mxu1 %v2065_v31  ;;  %v3120_v30 = vld [vmem:[#allocation31_spill] sm:$0xff]  ;;  %v3121_v31 = vld [vmem:[#allocation32_spill] sm:$0xff] }
 0x102   :  { %872 = vmatpush.msra.mxu2 %v2072_v33  ;;  %892 = vmatpush.msra.mxu3 %v2070_v32  ;;  %v3122_v32 = vld [vmem:[#allocation33_spill] sm:$0xff]  ;;  %v3123_v33 = vld [vmem:[#allocation34_spill] sm:$0xff] }
 0x103   :  { %833 = vmatpush.msra.mxu0 %v2081_v35  ;;  %853 = vmatpush.msra.mxu1 %v2083_v36  ;;  %v3124_v35 = vld [vmem:[#allocation35_spill] sm:$0xff]  ;;  %v3125_v36 = vld [vmem:[#allocation36_spill] sm:$0xff] }
 0x104   :  { %873 = vmatpush.msra.mxu2 %v2091_v38  ;;  %893 = vmatpush.msra.mxu3 %v2089_v37 }
 0x105   :  { %834 = vmatpush.msra.mxu0 %v2095_v39  ;;  %854 = vmatpush.msra.mxu1 %v2097_v40  ;;  %v3126_v39 = vld [vmem:[#allocation37_spill] sm:$0xff] }
 0x106   :  { %874 = vmatpush.msra.mxu2 %v2103_v42  ;;  %894 = vmatpush.msra.mxu3 %v2101_v41  ;;  %v3127_v41 = vld [vmem:[#allocation38_spill] sm:$0xff] }
 0x107   :  { %835 = vmatpush.msra.mxu0 %v2106_v43  ;;  %855 = vmatpush.msra.mxu1 %v2108_v44 }
 0x108   :  { %875 = vmatpush.msra.mxu2 %v2115_v46  ;;  %895 = vmatpush.msra.mxu3 %v2113_v45  ;;  %v3128_v46 = vld [vmem:[#allocation40_spill] sm:$0xff] }
 0x109   :  { %836 = vmatpush.msra.mxu0 %v2124_v48  ;;  %856 = vmatpush.msra.mxu1 %v2126_v49 }
 0x10a   :  { %876 = vmatpush.msra.mxu2 %v3100_v9  ;;  %896 = vmatpush.msra.mxu3 %v3101_v10 }
 0x10b   :  { %837 = vmatpush.msra.mxu0 %v3102_v11  ;;  %857 = vmatpush.msra.mxu1 %v3103_v12 }
 0x10c   :  { %877 = vmatpush.msra.mxu2 %v3104_v13  ;;  %897 = vmatpush.msra.mxu3 %v3105_v14 }
 0x10d   :  { %838 = vmatpush.msra.mxu0 %v3106_v15  ;;  %858 = vmatpush.msra.mxu1 %v3107_v16 }
 0x10e   :  { %878 = vmatpush.msra.mxu2 %v3108_v17  ;;  %898 = vmatpush.msra.mxu3 %v3109_v18 }
 0x10f   :  { %839 = vmatpush.msra.mxu0 %v3110_v19  ;;  %859 = vmatpush.msra.mxu1 %v3111_v21 }
 0x110   :  { %879 = vmatpush.msra.mxu2 %v3112_v22  ;;  %899 = vmatpush.msra.mxu3 %v3113_v23 }
 0x111   :  { %840 = vmatpush.msra.mxu0 %v3114_v24  ;;  %860 = vmatpush.msra.mxu1 %v3115_v25 }
 0x112   :  { %880 = vmatpush.msra.mxu2 %v3116_v26  ;;  %900 = vmatpush.msra.mxu3 %v3117_v27 }
 0x113   :  { %841 = vmatpush.msra.mxu0 %v3118_v28  ;;  %861 = vmatpush.msra.mxu1 %v3119_v29 }
 0x114   :  { %881 = vmatpush.msra.mxu2 %v3120_v30  ;;  %901 = vmatpush.msra.mxu3 %v3121_v31 }
 0x115   :  { %842 = vmatpush.msra.mxu0 %v3122_v32  ;;  %862 = vmatpush.msra.mxu1 %v3123_v33 }
 0x116   :  { %882 = vmatpush.msra.mxu2 %v3124_v35  ;;  %902 = vmatpush.msra.mxu3 %v3125_v36 }
 0x172   :  { %v532_v37 = vpop.f32.mrf.mxu0  ;;  %v552_v38 = vpop.f32.mrf.mxu1 }
 0x173   :  { %v595_v40 = vadd.f32 %v532_v37, %v3126_v39  ;;  %v596_v42 = vadd.f32 %v552_v38, %v3127_v41  ;;  %v2523_v37 = vld [vmem:[#allocation5 + $0x1e8] sm:$0xff]  ;;  %v2526_v38 = vld [vmem:[#allocation5 + $0x1f0] sm:$0xff]  ;;  %v2529_v39 = vld [vmem:[#allocation5 + $0x1f8] sm:$0xff] }
 0x174   :  { %v2535_v41 = vld [vmem:[#allocation5 + $0x1c8] sm:$0xff] }
 0x175   :  { %v1663_v43 = vmul.f32 -1.442695, %v595_v40  ;;  %v1664_v44 = vmul.f32 -1.442695, %v596_v42  ;;  %v2532_v40 = vld [vmem:[#allocation5 + $0x1c0] sm:$0xff]  ;;  %v2538_v42 = vld [vmem:[#allocation5 + $0x1d0] sm:$0xff] }
 0x177   :  { %1707 = vpow2.f32 %v1663_v43  ;;  %v2541_v43 = vld [vmem:[#allocation5 + $0x1d8] sm:$0xff] }
 0x178   :  { %1709 = vpow2.f32 %v1664_v44  ;;  %v2544_v44 = vld [vmem:[#allocation5 + $0x1a0] sm:$0xff] }
 0x179   :  { %v592_v45 = vpop.f32.mrf.mxu3  ;;  %v572_v54 = vpop.f32.mrf.mxu2 }
 0x17a   :  { %v598_v48 = vadd.f32 %v592_v45, %v3128_v46  ;;  %v597_v58 = vadd.f32 %v572_v54, %v3129_v60  ;;  %v2547_v45 = vld [vmem:[#allocation5 + $0x1a8] sm:$0xff]  ;;  %v2550_v46 = vld [vmem:[#allocation5 + $0x1b0] sm:$0xff] }
 0x17b   :  { %v2571_v54 = vld [vmem:[#allocation5 + $0x168] sm:$0xff] }
 0x17c   :  { %v1665_v49 = vmul.f32 -1.442695, %v598_v48  ;;  %v2553_v48 = vld [vmem:[#allocation5 + $0x1b8] sm:$0xff]  ;;  %v2583_v60 = vld [vmem:[#allocation5 + $0x148] sm:$0xff] }
 0x17d   :  { %v1708_v50 = vpop.eup %1707 }
 0x17e   :  { %v1710_v51 = vpop.eup %1709  ;;  %v602_v55 = vadd.f32 1.0, %v1708_v50  ;;  %1711 = vpow2.f32 %v1665_v49  ;;  %v2556_v49 = vld [vmem:[#allocation5 + $0x180] sm:$0xff]  ;;  %v2559_v50 = vld [vmem:[#allocation5 + $0x188] sm:$0xff] }
 0x17f   :  { %v621_v63 = vadd.f32 1.0, %v1710_v51  ;;  %v2562_v51 = vld [vmem:[#allocation5 + $0x190] sm:$0xff] }
 0x180   :  { %1713 = vrcp.f32 %v602_v55  ;;  %v614_v59 = vand.u32 2147483648, %v602_v55  ;;  %v612_v56 = vand.u32 2147483647, %v602_v55  ;;  %vm608_vm15 = vweird.f32 %v602_v55 }
 0x181   :  { %1715 = vrcp.f32 %v621_v63  ;;  %v633_v34 = vand.u32 2147483648, %v621_v63  ;;  %v631_v5 = vand.u32 2147483647, %v621_v63  ;;  %vm627_vm0 = vweird.f32 %v621_v63 }
 0x182   :  { %v615_v2 = vor.u32 1.1754944e-38, %v614_v59  ;;  %vm613_vm3 = vcmp.eq.f32.partialorder %v612_v56, 8.507059e+37  ;;  %v2604_v59 = vld [vmem:[#allocation5 + $0x100] sm:$0xff]  ;;  %v2613_v56 = vld [vmem:[#allocation5 + $0x118] sm:$0xff] }
 0x183   :  { %v634_v10 = vor.u32 1.1754944e-38, %v633_v34  ;;  %vm632_vm4 = vcmp.eq.f32.partialorder %v631_v5, 8.507059e+37  ;;  %v2607_v34 = vld [vmem:[#allocation5 + $0x108] sm:$0xff] }
 0x184   :  { %v1712_v6 = vpop.eup %1711  ;;  %v2619_v5 = vld [vmem:[#allocation5 + $0xe8] sm:$0xff] }
 0x185   :  { %v641_v20 = vadd.f32 1.0, %v1712_v6  ;;  %v2574_v6 = vld [vmem:[#allocation5 + $0x170] sm:$0xff] }
 0x186   :  { %v1714_v1 = vpop.eup %1713 }
 0x187   :  { %v1716_v8 = vpop.eup %1715  ;;  %v604_v57 = vmul.f32 %v1714_v1, %v602_v55  ;;  %1717 = vrcp.f32 %v641_v20  ;;  %vm609_vm13 = vweird.f32 %v1714_v1  ;;  %v653_v23 = vand.u32 2147483648, %v641_v20  ;;  %v2565_v55 = vld [vmem:[#allocation5 + $0x198] sm:$0xff] }
 0x188   :  { %v623_v52 = vmul.f32 %v1716_v8, %v621_v63  ;;  %1719 = vtanh.f32 %v597_v58  ;;  %vm628_vm14 = vweird.f32 %v1716_v8  ;;  %vm610_vm1 = vmor %vm608_vm15, %vm609_vm13  ;;  %vm647_vm6 = vweird.f32 %v641_v20  ;;  %v2568_v63 = vld [vmem:[#allocation5 + $0x160] sm:$0xff]  ;;  %v2586_v58 = vld [vmem:[#allocation5 + $0x150] sm:$0xff] }
 0x189   :  { %v605_v53 = vsub.f32 1.0, %v604_v57  ;;  %vm629_vm2 = vmor %vm627_vm0, %vm628_vm14  ;;  %v651_v24 = vand.u32 2147483647, %v641_v20  ;;  %v654_v26 = vor.u32 1.1754944e-38, %v653_v23  ;;  %v2592_v57 = vld [vmem:[#allocation5 + $0x120] sm:$0xff]  ;;  %v2670_v23 = vld [vmem:[#allocation5 + $0x70] sm:$0xff] }
 0x18a   :  { %v624_v7 = vsub.f32 1.0, %v623_v52  ;;  %v2595_v52 = vld [vmem:[#allocation5 + $0x128] sm:$0xff]  ;;  %3142 = vst [vmem:[#allocation24_spill] sm:$0xff] %v2670_v23 }
 0x18b   :  { %v606_v61 = vmul.f32 %v1714_v1, %v605_v53  ;;  %vm652_vm8 = vcmp.eq.f32.partialorder %v651_v24, 8.507059e+37  ;;  %v2598_v53 = vld [vmem:[#allocation5 + $0x130] sm:$0xff]  ;;  %v2673_v24 = vld [vmem:[#allocation5 + $0x78] sm:$0xff] }
 0x18c   :  { %v625_v0 = vmul.f32 %v1716_v8, %v624_v7  ;;  %v2601_v7 = vld [vmem:[#allocation5 + $0x138] sm:$0xff]  ;;  %3143 = vst [vmem:[#allocation23_spill] sm:$0xff] %v2673_v24 }
 0x18d   :  { %v1718_v62 = vpop.eup %1717  ;;  %v607_v3 = vadd.f32 %v1714_v1, %v606_v61  ;;  %v2610_v61 = vld [vmem:[#allocation5 + $0x110] sm:$0xff] }
 0x18e   :  { %v626_v4 = vadd.f32 %v1716_v8, %v625_v0  ;;  %v643_v9 = vmul.f32 %v1718_v62, %v641_v20  ;;  %v1720_v12 = vpop.eup %1719  ;;  %vm648_vm5 = vweird.f32 %v1718_v62  ;;  %v2577_v20 = vld [vmem:[#allocation5 + $0x178] sm:$0xff]  ;;  %v2616_v0 = vld [vmem:[#allocation5 + $0xe0] sm:$0xff] }
 0x18f   :  { %v611_v11 = vsel %vm610_vm1, %v1714_v1, %v607_v3  ;;  %vm649_vm7 = vmor %vm647_vm6, %vm648_vm5  ;;  %v2580_v1 = vld [vmem:[#allocation5 + $0x140] sm:$0xff]  ;;  %v2625_v3 = vld [vmem:[#allocation5 + $0xf8] sm:$0xff] }
 0x190   :  { %v616_v13 = vsel %vm613_vm3, %v615_v2, %v611_v11  ;;  %v630_v14 = vsel %vm629_vm2, %v1716_v8, %v626_v4  ;;  %v644_v15 = vsub.f32 1.0, %v643_v9  ;;  %v2589_v8 = vld [vmem:[#allocation5 + $0x158] sm:$0xff]  ;;  %v2628_v2 = vld [vmem:[#allocation5 + $0xc0] sm:$0xff]  ;;  %v2631_v4 = vld [vmem:[#allocation5 + $0xc8] sm:$0xff] }
 0x191   :  { %v635_v16 = vsel %vm632_vm4, %v634_v10, %v630_v14  ;;  %v658_v17 = vmul.f32 %v1720_v12, %v616_v13  ;;  %v2634_v9 = vld [vmem:[#allocation5 + $0xd0] sm:$0xff]  ;;  %v2637_v10 = vld [vmem:[#allocation5 + $0xd8] sm:$0xff]  ;;  %v2640_v11 = vld [vmem:[#allocation5 + $0xa0] sm:$0xff] }
 0x192   :  { %v657_v18 = vmul.f32 %v635_v16, %v2445_v47  ;;  %v645_v19 = vmul.f32 %v1718_v62, %v644_v15  ;;  %v2520_v47 = vld [vmem:[#allocation5 + $0x1e0] sm:$0xff]  ;;  %3130 = vst [vmem:[#allocation12_spill] sm:$0xff] %v2634_v9  ;;  %v2643_v12 = vld [vmem:[#allocation5 + $0xa8] sm:$0xff]  ;;  %v2646_v13 = vld [vmem:[#allocation5 + $0xb0] sm:$0xff] }
 0x193   :  { %3131 = vst [vmem:[#allocation11_spill] sm:$0xff] %v2637_v10  ;;  %v2649_v14 = vld [vmem:[#allocation5 + $0xb8] sm:$0xff]  ;;  %v2652_v15 = vld [vmem:[#allocation5 + $0x80] sm:$0xff]  ;;  %v2655_v16 = vld [vmem:[#allocation5 + $0x88] sm:$0xff] }
 0x194   :  { %v2517_v21 = vadd.f32 %v658_v17, %v657_v18  ;;  %v646_v22 = vadd.f32 %v1718_v62, %v645_v19  ;;  %3132 = vst [vmem:[#allocation13_spill] sm:$0xff] %v2640_v11  ;;  %v2658_v17 = vld [vmem:[#allocation5 + $0x90] sm:$0xff]  ;;  %v2661_v18 = vld [vmem:[#allocation5 + $0x98] sm:$0xff]  ;;  %v2664_v19 = vld [vmem:[#allocation5 + $0x60] sm:$0xff] }
 0x195   :  { %3133 = vst [vmem:[#allocation14_spill] sm:$0xff] %v2643_v12 }
 0x196   :  { %1721 = vtanh.f32 %v2517_v21  ;;  %v650_v25 = vsel %vm649_vm7, %v1718_v62, %v646_v22  ;;  %v2622_v62 = vld [vmem:[#allocation5 + $0xf0] sm:$0xff]  ;;  %3134 = vst [vmem:[#allocation16_spill] sm:$0xff] %v2646_v13  ;;  %v2667_v22 = vld [vmem:[#allocation5 + $0x68] sm:$0xff] }
 0x197   :  { %v655_v28 = vsel %vm652_vm8, %v654_v26, %v650_v25  ;;  %3135 = vst [vmem:[#allocation15_spill] sm:$0xff] %v2649_v14  ;;  %v2676_v25 = vld [vmem:[#allocation5 + $0x40] sm:$0xff]  ;;  %v2679_v26 = vld [vmem:[#allocation5 + $0x48] sm:$0xff] }
 0x198   :  { %3136 = vst [vmem:[#allocation17_spill] sm:$0xff] %v2652_v15 }
 0x199   :  { %3137 = vst [vmem:[#allocation18_spill] sm:$0xff] %v2655_v16 }
 0x19a   :  { %3138 = vst [vmem:[#allocation20_spill] sm:$0xff] %v2658_v17 }
 0x19b   :  { %3139 = vst [vmem:[#allocation19_spill] sm:$0xff] %v2661_v18 }
 0x19c   :  { %v1722_v27 = vpop.eup %1721  ;;  %3140 = vst [vmem:[#allocation21_spill] sm:$0xff] %v2664_v19 }
 0x19d   :  { %v661_v29 = vmul.f32 %v1722_v27, %v655_v28  ;;  %3141 = vst [vmem:[#allocation22_spill] sm:$0xff] %v2667_v22  ;;  %v2682_v27 = vld [vmem:[#allocation5 + $0x50] sm:$0xff]  ;;  %v2685_v28 = vld [vmem:[#allocation5 + $0x58] sm:$0xff] }
 0x19e   :  { %3144 = vst [vmem:[#allocation25_spill] sm:$0xff] %v2676_v25 }
 0x19f   :  { %663 = vst [vmem:[#allocation8 + $0x8] sm:$0xff] %v661_v29  ;;  %687 = vmatmul.f32.vlgmr.msrb.gmra.mxu0 %v661_v29  ;;  %707 = vmatmul.f32.vlgmr.msrb.gmra.mxu1 %v661_v29 }
 0x1a0   :  { %727 = vmatmul.f32.vlgmr.msrb.gmra.mxu2 %v661_v29  ;;  %747 = vmatmul.f32.vlgmr.msrb.gmra.mxu3 %v661_v29  ;;  %3145 = vst [vmem:[#allocation26_spill] sm:$0xff] %v2679_v26  ;;  %v2688_v29 = vld [vmem:[#allocation5 + $0x20] sm:$0xff] }
 0x1a1   :  { %983 = vmatpush.msrb.mxu0 %v2520_v47  ;;  %1003 = vmatpush.msrb.mxu1 %v2523_v37  ;;  %3146 = vst [vmem:[#allocation28_spill] sm:$0xff] %v2682_v27 }
 0x1a2   :  { %1023 = vmatpush.msrb.mxu2 %v2526_v38  ;;  %1043 = vmatpush.msrb.mxu3 %v2529_v39  ;;  %3147 = vst [vmem:[#allocation27_spill] sm:$0xff] %v2685_v28 }
 0x1a3   :  { %984 = vmatpush.msrb.mxu0 %v2532_v40  ;;  %1004 = vmatpush.msrb.mxu1 %v2535_v41  ;;  %3148 = vst [vmem:[#allocation29_spill] sm:$0xff] %v2688_v29 }
 0x1a4   :  { %1024 = vmatpush.msrb.mxu2 %v2538_v42  ;;  %1044 = vmatpush.msrb.mxu3 %v2541_v43 }
 0x1a5   :  { %985 = vmatpush.msrb.mxu0 %v2544_v44  ;;  %1005 = vmatpush.msrb.mxu1 %v2547_v45 }
 0x1a6   :  { %1025 = vmatpush.msrb.mxu2 %v2550_v46  ;;  %1045 = vmatpush.msrb.mxu3 %v2553_v48 }
 0x1a7   :  { %986 = vmatpush.msrb.mxu0 %v2556_v49  ;;  %1006 = vmatpush.msrb.mxu1 %v2559_v50 }
 0x1a8   :  { %1026 = vmatpush.msrb.mxu2 %v2562_v51  ;;  %1046 = vmatpush.msrb.mxu3 %v2565_v55 }
 0x1a9   :  { %987 = vmatpush.msrb.mxu0 %v2568_v63  ;;  %1007 = vmatpush.msrb.mxu1 %v2571_v54 }
 0x1aa   :  { %1027 = vmatpush.msrb.mxu2 %v2574_v6  ;;  %1047 = vmatpush.msrb.mxu3 %v2577_v20 }
 0x1ab   :  { %988 = vmatpush.msrb.mxu0 %v2580_v1  ;;  %1008 = vmatpush.msrb.mxu1 %v2583_v60 }
 0x1ac   :  { %1028 = vmatpush.msrb.mxu2 %v2586_v58  ;;  %1048 = vmatpush.msrb.mxu3 %v2589_v8 }
 0x1ad   :  { %989 = vmatpush.msrb.mxu0 %v2592_v57  ;;  %1009 = vmatpush.msrb.mxu1 %v2595_v52 }
 0x1ae   :  { %1029 = vmatpush.msrb.mxu2 %v2598_v53  ;;  %1049 = vmatpush.msrb.mxu3 %v2601_v7 }
 0x1af   :  { %990 = vmatpush.msrb.mxu0 %v2604_v59  ;;  %1010 = vmatpush.msrb.mxu1 %v2607_v34 }
 0x1b0   :  { %1030 = vmatpush.msrb.mxu2 %v2610_v61  ;;  %1050 = vmatpush.msrb.mxu3 %v2613_v56 }
 0x1b1   :  { %991 = vmatpush.msrb.mxu0 %v2616_v0  ;;  %1011 = vmatpush.msrb.mxu1 %v2619_v5 }
 0x1b2   :  { %1031 = vmatpush.msrb.mxu2 %v2622_v62  ;;  %1051 = vmatpush.msrb.mxu3 %v2625_v3 }
 0x1b3   :  { %992 = vmatpush.msrb.mxu0 %v2628_v2  ;;  %1012 = vmatpush.msrb.mxu1 %v2631_v4 }
 0x1b4   :  { %1032 = vmatpush.msrb.mxu2 %v2634_v9  ;;  %1052 = vmatpush.msrb.mxu3 %v2637_v10 }
 0x1b5   :  { %993 = vmatpush.msrb.mxu0 %v2640_v11  ;;  %1013 = vmatpush.msrb.mxu1 %v2643_v12 }
 0x1b6   :  { %1033 = vmatpush.msrb.mxu2 %v2646_v13  ;;  %1053 = vmatpush.msrb.mxu3 %v2649_v14 }
 0x1b7   :  { %994 = vmatpush.msrb.mxu0 %v2652_v15  ;;  %1014 = vmatpush.msrb.mxu1 %v2655_v16 }
 0x1b8   :  { %1034 = vmatpush.msrb.mxu2 %v2658_v17  ;;  %1054 = vmatpush.msrb.mxu3 %v2661_v18 }
 0x1b9   :  { %995 = vmatpush.msrb.mxu0 %v2664_v19  ;;  %1015 = vmatpush.msrb.mxu1 %v2667_v22 }
 0x1ba   :  { %1035 = vmatpush.msrb.mxu2 %v2670_v23  ;;  %1055 = vmatpush.msrb.mxu3 %v2673_v24  ;;  %v2691_v24 = vld [vmem:[#allocation5 + $0x28] sm:$0xff] }
 0x1bb   :  { %996 = vmatpush.msrb.mxu0 %v2676_v25  ;;  %1016 = vmatpush.msrb.mxu1 %v2679_v26  ;;  %3149 = vst [vmem:[#allocation30_spill] sm:$0xff] %v2691_v24  ;;  %v3150_v26 = vld [vmem:[#allocation41_spill] sm:$0xff]  ;;  %v3151_v25 = vld [vmem:[#allocation42_spill] sm:$0xff] }
 0x1bc   :  { %1036 = vmatpush.msrb.mxu2 %v2682_v27  ;;  %1056 = vmatpush.msrb.mxu3 %v2685_v28 }
 0x1bd   :  { %997 = vmatpush.msrb.mxu0 %v2688_v29  ;;  %1017 = vmatpush.msrb.mxu1 %v2691_v24 }
 0x1be   :  { %1037 = vmatpush.msrb.mxu2 %v3120_v30  ;;  %1057 = vmatpush.msrb.mxu3 %v3121_v31  ;;  %v3152_v31 = vld [vmem:[#allocation44_spill] sm:$0xff] }
 0x1bf   :  { %998 = vmatpush.msrb.mxu0 %v3122_v32  ;;  %1018 = vmatpush.msrb.mxu1 %v3123_v33 }
 0x1c0   :  { %1038 = vmatpush.msrb.mxu2 %v3124_v35  ;;  %1058 = vmatpush.msrb.mxu3 %v3125_v36 }
 0x21c   :  { %v688_v28 = vpop.f32.mrf.mxu0  ;;  %v708_v27 = vpop.f32.mrf.mxu1 }
 0x21d   :  { %v751_v29 = vadd.f32 %v688_v28, %v3150_v26  ;;  %v752_v23 = vadd.f32 %v708_v27, %v3151_v25  ;;  %v3153_v25 = vld [vmem:[#allocation43_spill] sm:$0xff] }
 0x21f   :  { %v1666_v22 = vmul.f32 -1.442695, %v751_v29  ;;  %v1667_v24 = vmul.f32 -1.442695, %v752_v23 }
 0x221   :  { %1723 = vpow2.f32 %v1666_v22 }
 0x222   :  { %1725 = vpow2.f32 %v1667_v24 }
 0x223   :  { %v748_v30 = vpop.f32.mrf.mxu3  ;;  %v728_v36 = vpop.f32.mrf.mxu2 }
 0x224   :  { %v754_v19 = vadd.f32 %v748_v30, %v3152_v31  ;;  %v753_v27 = vadd.f32 %v728_v36, %v3153_v25 }
 0x226   :  { %v1668_v32 = vmul.f32 -1.442695, %v754_v19 }
 0x227   :  { %v1724_v18 = vpop.eup %1723 }
 0x228   :  { %v1726_v33 = vpop.eup %1725  ;;  %v758_v17 = vadd.f32 1.0, %v1724_v18  ;;  %1727 = vpow2.f32 %v1668_v32 }
 0x229   :  { %v777_v35 = vadd.f32 1.0, %v1726_v33 }
 0x22a   :  { %1729 = vrcp.f32 %v758_v17  ;;  %v770_v19 = vand.u32 2147483648, %v758_v17  ;;  %v768_v32 = vand.u32 2147483647, %v758_v17  ;;  %vm764_vm11 = vweird.f32 %v758_v17 }
 0x22b   :  { %1731 = vrcp.f32 %v777_v35  ;;  %v789_v31 = vand.u32 2147483648, %v777_v35  ;;  %v787_v15 = vand.u32 2147483647, %v777_v35  ;;  %vm783_vm12 = vweird.f32 %v777_v35 }
 0x22c   :  { %v771_v36 = vor.u32 1.1754944e-38, %v770_v19  ;;  %vm769_vm15 = vcmp.eq.f32.partialorder %v768_v32, 8.507059e+37 }
 0x22d   :  { %vm788_vm0 = vcmp.eq.f32.partialorder %v787_v15, 8.507059e+37 }
 0x22e   :  { %v1728_v16 = vpop.eup %1727 }
 0x22f   :  { %v797_v26 = vadd.f32 1.0, %v1728_v16 }
 0x230   :  { %v1730_v28 = vpop.eup %1729 }
 0x231   :  { %v1732_v23 = vpop.eup %1731  ;;  %v760_v22 = vmul.f32 %v1730_v28, %v758_v17  ;;  %1733 = vrcp.f32 %v797_v26  ;;  %vm765_vm9 = vweird.f32 %v1730_v28  ;;  %v809_v19 = vand.u32 2147483648, %v797_v26 }
 0x232   :  { %v779_v24 = vmul.f32 %v1732_v23, %v777_v35  ;;  %1735 = vtanh.f32 %v753_v27  ;;  %vm784_vm10 = vweird.f32 %v1732_v23  ;;  %vm766_vm13 = vmor %vm764_vm11, %vm765_vm9  ;;  %vm803_vm2 = vweird.f32 %v797_v26 }
 0x233   :  { %v761_v29 = vsub.f32 1.0, %v760_v22  ;;  %vm785_vm14 = vmor %vm783_vm12, %vm784_vm10  ;;  %v790_v22 = vor.u32 1.1754944e-38, %v789_v31  ;;  %v810_v32 = vor.u32 1.1754944e-38, %v809_v19  ;;  %v3172_v19 = vld [vmem:[#allocation29_spill] sm:$0xff] }
 0x234   :  { %v780_v30 = vsub.f32 1.0, %v779_v24 }
 0x235   :  { %v762_v18 = vmul.f32 %v1730_v28, %v761_v29 }
 0x236   :  { %v781_v33 = vmul.f32 %v1732_v23, %v780_v30 }
 0x237   :  { %v1734_v14 = vpop.eup %1733  ;;  %v763_v16 = vadd.f32 %v1730_v28, %v762_v18 }
 0x238   :  { %v782_v25 = vadd.f32 %v1732_v23, %v781_v33  ;;  %v799_v13 = vmul.f32 %v1734_v14, %v797_v26  ;;  %v1736_v27 = vpop.eup %1735  ;;  %vm804_vm1 = vweird.f32 %v1734_v14  ;;  %v3161_v33 = vld [vmem:[#allocation18_spill] sm:$0xff] }
 0x239   :  { %v767_v24 = vsel %vm766_vm13, %v1730_v28, %v763_v16  ;;  %v807_v28 = vand.u32 2147483647, %v797_v26  ;;  %vm805_vm3 = vmor %vm803_vm2, %vm804_vm1  ;;  %v3160_v26 = vld [vmem:[#allocation17_spill] sm:$0xff]  ;;  %v3162_v16 = vld [vmem:[#allocation20_spill] sm:$0xff] }
 0x23a   :  { %v772_v12 = vsel %vm769_vm15, %v771_v36, %v767_v24  ;;  %v786_v29 = vsel %vm785_vm14, %v1732_v23, %v782_v25  ;;  %v800_v11 = vsub.f32 1.0, %v799_v13  ;;  %v3163_v36 = vld [vmem:[#allocation19_spill] sm:$0xff]  ;;  %v3164_v25 = vld [vmem:[#allocation21_spill] sm:$0xff]  ;;  %v3166_v24 = vld [vmem:[#allocation24_spill] sm:$0xff] }
 0x23b   :  { %v791_v30 = vsel %vm788_vm0, %v790_v22, %v786_v29  ;;  %v814_v10 = vmul.f32 %v1736_v27, %v772_v12  ;;  %vm808_vm4 = vcmp.eq.f32.partialorder %v807_v28, 8.507059e+37  ;;  %v3158_v12 = vld [vmem:[#allocation16_spill] sm:$0xff]  ;;  %v3165_v22 = vld [vmem:[#allocation22_spill] sm:$0xff]  ;;  %v3167_v27 = vld [vmem:[#allocation23_spill] sm:$0xff] }
 0x23c   :  { %v813_v9 = vmul.f32 %v791_v30, %v2517_v21  ;;  %v801_v18 = vmul.f32 %v1734_v14, %v800_v11  ;;  %v3154_v21 = vld [vmem:[#allocation12_spill] sm:$0xff]  ;;  %v3157_v11 = vld [vmem:[#allocation14_spill] sm:$0xff]  ;;  %v3168_v29 = vld [vmem:[#allocation25_spill] sm:$0xff] }
 0x23d   :  { %v3169_v30 = vld [vmem:[#allocation26_spill] sm:$0xff] }
 0x23e   :  { %v2705_v17 = vadd.f32 %v814_v10, %v813_v9  ;;  %v802_v35 = vadd.f32 %v1734_v14, %v801_v18  ;;  %v3155_v9 = vld [vmem:[#allocation11_spill] sm:$0xff]  ;;  %v3156_v10 = vld [vmem:[#allocation13_spill] sm:$0xff]  ;;  %v3170_v18 = vld [vmem:[#allocation28_spill] sm:$0xff] }
 0x23f   :  { %v3173_v28 = vld [vmem:[#allocation30_spill] sm:$0xff] }
 0x240   :  { %1737 = vtanh.f32 %v2705_v17  ;;  %v806_v31 = vsel %vm805_vm3, %v1734_v14, %v802_v35  ;;  %v3159_v14 = vld [vmem:[#allocation15_spill] sm:$0xff] }
 0x241   :  { %v811_v13 = vsel %vm808_vm4, %v810_v32, %v806_v31  ;;  %v3171_v35 = vld [vmem:[#allocation27_spill] sm:$0xff]  ;;  %v2766_v31 = vld [vmem:[#allocation5 + $0x30] sm:$0xff]  ;;  %v2769_v32 = vld [vmem:[#allocation5 + $0x38] sm:$0xff] }
 0x242   :  { %3174 = vst [vmem:[#allocation31_spill] sm:$0xff] %v2766_v31 }
 0x243   :  { %3175 = vst [vmem:[#allocation32_spill] sm:$0xff] %v2769_v32 }
 0x246   :  { %v1738_v15 = vpop.eup %1737 }
 0x247   :  { %v817_v23 = vmul.f32 %v1738_v15, %v811_v13  ;;  %v2772_v15 = vld [vmem:[#allocation5] sm:$0xff]  ;;  %v2775_v13 = vld [vmem:[#allocation5 + $0x8] sm:$0xff] }
 0x248   :  { %3176 = vst [vmem:[#allocation33_spill] sm:$0xff] %v2772_v15 }
 0x249   :  { %819 = vst [vmem:[#allocation8 + $0x10] sm:$0xff] %v817_v23  ;;  %843 = vmatmul.f32.vlgmr.msra.gmra.mxu0 %v817_v23  ;;  %863 = vmatmul.f32.vlgmr.msra.gmra.mxu1 %v817_v23 }
 0x24a   :  { %883 = vmatmul.f32.vlgmr.msra.gmra.mxu2 %v817_v23  ;;  %903 = vmatmul.f32.vlgmr.msra.gmra.mxu3 %v817_v23  ;;  %3177 = vst [vmem:[#allocation34_spill] sm:$0xff] %v2775_v13  ;;  %v2778_v23 = vld [vmem:[#allocation5 + $0x10] sm:$0xff] }
 0x24b   :  { %1139 = vmatpush.msra.mxu0 %v2520_v47  ;;  %1159 = vmatpush.msra.mxu1 %v2523_v37  ;;  %3178 = vst [vmem:[#allocation35_spill] sm:$0xff] %v2778_v23 }
 0x24c   :  { %1179 = vmatpush.msra.mxu2 %v2526_v38  ;;  %1199 = vmatpush.msra.mxu3 %v2529_v39 }
 0x24d   :  { %1140 = vmatpush.msra.mxu0 %v2532_v40  ;;  %1160 = vmatpush.msra.mxu1 %v2535_v41 }
 0x24e   :  { %1180 = vmatpush.msra.mxu2 %v2538_v42  ;;  %1200 = vmatpush.msra.mxu3 %v2541_v43 }
 0x24f   :  { %1141 = vmatpush.msra.mxu0 %v2544_v44  ;;  %1161 = vmatpush.msra.mxu1 %v2547_v45 }
 0x250   :  { %1181 = vmatpush.msra.mxu2 %v2550_v46  ;;  %1201 = vmatpush.msra.mxu3 %v2553_v48 }
 0x251   :  { %1142 = vmatpush.msra.mxu0 %v2556_v49  ;;  %1162 = vmatpush.msra.mxu1 %v2559_v50 }
 0x252   :  { %1182 = vmatpush.msra.mxu2 %v2562_v51  ;;  %1202 = vmatpush.msra.mxu3 %v2565_v55 }
 0x253   :  { %1143 = vmatpush.msra.mxu0 %v2568_v63  ;;  %1163 = vmatpush.msra.mxu1 %v2571_v54 }
 0x254   :  { %1183 = vmatpush.msra.mxu2 %v2574_v6  ;;  %1203 = vmatpush.msra.mxu3 %v2577_v20 }
 0x255   :  { %1144 = vmatpush.msra.mxu0 %v2580_v1  ;;  %1164 = vmatpush.msra.mxu1 %v2583_v60 }
 0x256   :  { %1184 = vmatpush.msra.mxu2 %v2586_v58  ;;  %1204 = vmatpush.msra.mxu3 %v2589_v8 }
 0x257   :  { %1145 = vmatpush.msra.mxu0 %v2592_v57  ;;  %1165 = vmatpush.msra.mxu1 %v2595_v52 }
 0x258   :  { %1185 = vmatpush.msra.mxu2 %v2598_v53  ;;  %1205 = vmatpush.msra.mxu3 %v2601_v7 }
 0x259   :  { %1146 = vmatpush.msra.mxu0 %v2604_v59  ;;  %1166 = vmatpush.msra.mxu1 %v2607_v34 }
 0x25a   :  { %1186 = vmatpush.msra.mxu2 %v2610_v61  ;;  %1206 = vmatpush.msra.mxu3 %v2613_v56 }
 0x25b   :  { %1147 = vmatpush.msra.mxu0 %v2616_v0  ;;  %1167 = vmatpush.msra.mxu1 %v2619_v5 }
 0x25c   :  { %1187 = vmatpush.msra.mxu2 %v2622_v62  ;;  %1207 = vmatpush.msra.mxu3 %v2625_v3 }
 0x25d   :  { %1148 = vmatpush.msra.mxu0 %v2628_v2  ;;  %1168 = vmatpush.msra.mxu1 %v2631_v4 }
 0x25e   :  { %1188 = vmatpush.msra.mxu2 %v3154_v21  ;;  %1208 = vmatpush.msra.mxu3 %v3155_v9 }
 0x25f   :  { %1149 = vmatpush.msra.mxu0 %v3156_v10  ;;  %1169 = vmatpush.msra.mxu1 %v3157_v11 }
 0x260   :  { %1189 = vmatpush.msra.mxu2 %v3158_v12  ;;  %1209 = vmatpush.msra.mxu3 %v3159_v14 }
 0x261   :  { %1150 = vmatpush.msra.mxu0 %v3160_v26  ;;  %1170 = vmatpush.msra.mxu1 %v3161_v33 }
 0x262   :  { %1190 = vmatpush.msra.mxu2 %v3162_v16  ;;  %1210 = vmatpush.msra.mxu3 %v3163_v36 }
 0x263   :  { %1151 = vmatpush.msra.mxu0 %v3164_v25  ;;  %1171 = vmatpush.msra.mxu1 %v3165_v22 }
 0x264   :  { %1191 = vmatpush.msra.mxu2 %v3166_v24  ;;  %1211 = vmatpush.msra.mxu3 %v3167_v27 }
 0x265   :  { %1152 = vmatpush.msra.mxu0 %v3168_v29  ;;  %1172 = vmatpush.msra.mxu1 %v3169_v30 }
 0x266   :  { %1192 = vmatpush.msra.mxu2 %v3170_v18  ;;  %1212 = vmatpush.msra.mxu3 %v3171_v35  ;;  %v3180_v35 = vld [vmem:[#allocation45_spill] sm:$0xff]  ;;  %v3181_v18 = vld [vmem:[#allocation46_spill] sm:$0xff] }
 0x267   :  { %1153 = vmatpush.msra.mxu0 %v3172_v19  ;;  %1173 = vmatpush.msra.mxu1 %v3173_v28  ;;  %v2781_v28 = vld [vmem:[#allocation5 + $0x18] sm:$0xff] }
 0x268   :  { %1193 = vmatpush.msra.mxu2 %v2766_v31  ;;  %1213 = vmatpush.msra.mxu3 %v2769_v32  ;;  %3179 = vst [vmem:[#allocation36_spill] sm:$0xff] %v2781_v28 }
 0x269   :  { %1154 = vmatpush.msra.mxu0 %v2772_v15  ;;  %1174 = vmatpush.msra.mxu1 %v2775_v13  ;;  %v3182_v13 = vld [vmem:[#allocation48_spill] sm:$0xff] }
 0x26a   :  { %1194 = vmatpush.msra.mxu2 %v2778_v23  ;;  %1214 = vmatpush.msra.mxu3 %v2781_v28 }
 0x2c6   :  { %v844_v31 = vpop.f32.mrf.mxu0  ;;  %v864_v19 = vpop.f32.mrf.mxu1 }
 0x2c7   :  { %v907_v32 = vadd.f32 %v844_v31, %v3180_v35  ;;  %v908_v30 = vadd.f32 %v864_v19, %v3181_v18  ;;  %v3183_v18 = vld [vmem:[#allocation47_spill] sm:$0xff] }
 0x2c9   :  { %v1669_v29 = vmul.f32 -1.442695, %v907_v32  ;;  %v1670_v15 = vmul.f32 -1.442695, %v908_v30 }
 0x2cb   :  { %1739 = vpow2.f32 %v1669_v29 }
 0x2cc   :  { %1741 = vpow2.f32 %v1670_v15 }
 0x2cd   :  { %v904_v27 = vpop.f32.mrf.mxu3  ;;  %v884_v28 = vpop.f32.mrf.mxu2 }
 0x2ce   :  { %v910_v24 = vadd.f32 %v904_v27, %v3182_v13  ;;  %v909_v19 = vadd.f32 %v884_v28, %v3183_v18 }
 0x2d0   :  { %v1671_v22 = vmul.f32 -1.442695, %v910_v24 }
 0x2d1   :  { %v1740_v25 = vpop.eup %1739 }
 0x2d2   :  { %v1742_v23 = vpop.eup %1741  ;;  %v914_v36 = vadd.f32 1.0, %v1740_v25  ;;  %1743 = vpow2.f32 %v1671_v22 }
 0x2d3   :  { %v933_v16 = vadd.f32 1.0, %v1742_v23 }
 0x2d4   :  { %1745 = vrcp.f32 %v914_v36  ;;  %v926_v24 = vand.u32 2147483648, %v914_v36  ;;  %v924_v22 = vand.u32 2147483647, %v914_v36  ;;  %vm920_vm7 = vweird.f32 %v914_v36 }
 0x2d5   :  { %1747 = vrcp.f32 %v933_v16  ;;  %v945_v13 = vand.u32 2147483648, %v933_v16  ;;  %v943_v26 = vand.u32 2147483647, %v933_v16  ;;  %vm939_vm8 = vweird.f32 %v933_v16 }
 0x2d6   :  { %v927_v28 = vor.u32 1.1754944e-38, %v926_v24  ;;  %vm925_vm11 = vcmp.eq.f32.partialorder %v924_v22, 8.507059e+37 }
 0x2d7   :  { %vm944_vm12 = vcmp.eq.f32.partialorder %v943_v26, 8.507059e+37 }
 0x2d8   :  { %v1744_v33 = vpop.eup %1743 }
 0x2d9   :  { %v953_v35 = vadd.f32 1.0, %v1744_v33 }
 0x2da   :  { %v1746_v31 = vpop.eup %1745 }
 0x2db   :  { %v1748_v30 = vpop.eup %1747  ;;  %v916_v29 = vmul.f32 %v1746_v31, %v914_v36  ;;  %1749 = vrcp.f32 %v953_v35  ;;  %vm921_vm5 = vweird.f32 %v1746_v31  ;;  %v965_v24 = vand.u32 2147483648, %v953_v35 }
 0x2dc   :  { %v935_v32 = vmul.f32 %v1748_v30, %v933_v16  ;;  %1751 = vtanh.f32 %v909_v19  ;;  %vm940_vm6 = vweird.f32 %v1748_v30  ;;  %vm922_vm9 = vmor %vm920_vm7, %vm921_vm5  ;;  %vm959_vm14 = vweird.f32 %v953_v35 }
 0x2dd   :  { %v917_v15 = vsub.f32 1.0, %v916_v29  ;;  %vm941_vm10 = vmor %vm939_vm8, %vm940_vm6  ;;  %v946_v29 = vor.u32 1.1754944e-38, %v945_v13  ;;  %v966_v22 = vor.u32 1.1754944e-38, %v965_v24  ;;  %v3202_v24 = vld [vmem:[#allocation29_spill] sm:$0xff] }
 0x2de   :  { %v936_v27 = vsub.f32 1.0, %v935_v32 }
 0x2df   :  { %v918_v25 = vmul.f32 %v1746_v31, %v917_v15 }
 0x2e0   :  { %v937_v23 = vmul.f32 %v1748_v30, %v936_v27 }
 0x2e1   :  { %v1750_v14 = vpop.eup %1749  ;;  %v919_v33 = vadd.f32 %v1746_v31, %v918_v25 }
 0x2e2   :  { %v938_v18 = vadd.f32 %v1748_v30, %v937_v23  ;;  %v955_v12 = vmul.f32 %v1750_v14, %v953_v35  ;;  %v1752_v19 = vpop.eup %1751  ;;  %vm960_vm13 = vweird.f32 %v1750_v14  ;;  %v3191_v23 = vld [vmem:[#allocation18_spill] sm:$0xff] }
 0x2e3   :  { %v923_v32 = vsel %vm922_vm9, %v1746_v31, %v919_v33  ;;  %v963_v31 = vand.u32 2147483647, %v953_v35  ;;  %vm961_vm15 = vmor %vm959_vm14, %vm960_vm13  ;;  %v3190_v35 = vld [vmem:[#allocation17_spill] sm:$0xff]  ;;  %v3192_v33 = vld [vmem:[#allocation20_spill] sm:$0xff] }
 0x2e4   :  { %v928_v11 = vsel %vm925_vm11, %v927_v28, %v923_v32  ;;  %v942_v15 = vsel %vm941_vm10, %v1748_v30, %v938_v18  ;;  %v956_v10 = vsub.f32 1.0, %v955_v12  ;;  %v3193_v28 = vld [vmem:[#allocation19_spill] sm:$0xff]  ;;  %v3194_v18 = vld [vmem:[#allocation21_spill] sm:$0xff]  ;;  %v3196_v32 = vld [vmem:[#allocation24_spill] sm:$0xff] }
 0x2e5   :  { %v947_v27 = vsel %vm944_vm12, %v946_v29, %v942_v15  ;;  %v970_v9 = vmul.f32 %v1752_v19, %v928_v11  ;;  %vm964_vm0 = vcmp.eq.f32.partialorder %v963_v31, 8.507059e+37  ;;  %v3188_v11 = vld [vmem:[#allocation16_spill] sm:$0xff]  ;;  %v3195_v29 = vld [vmem:[#allocation22_spill] sm:$0xff]  ;;  %v3197_v19 = vld [vmem:[#allocation23_spill] sm:$0xff] }
 0x2e6   :  { %v969_v21 = vmul.f32 %v947_v27, %v2705_v17  ;;  %v957_v25 = vmul.f32 %v1750_v14, %v956_v10  ;;  %v3184_v17 = vld [vmem:[#allocation12_spill] sm:$0xff]  ;;  %v3187_v10 = vld [vmem:[#allocation14_spill] sm:$0xff]  ;;  %v3198_v15 = vld [vmem:[#allocation25_spill] sm:$0xff] }
 0x2e7   :  { %v3199_v27 = vld [vmem:[#allocation26_spill] sm:$0xff] }
 0x2e8   :  { %v2789_v36 = vadd.f32 %v970_v9, %v969_v21  ;;  %v958_v16 = vadd.f32 %v1750_v14, %v957_v25  ;;  %v3185_v21 = vld [vmem:[#allocation11_spill] sm:$0xff]  ;;  %v3186_v9 = vld [vmem:[#allocation13_spill] sm:$0xff]  ;;  %v3200_v25 = vld [vmem:[#allocation28_spill] sm:$0xff] }
 0x2e9   :  { %v3203_v31 = vld [vmem:[#allocation30_spill] sm:$0xff] }
 0x2ea   :  { %1753 = vtanh.f32 %v2789_v36  ;;  %v962_v13 = vsel %vm961_vm15, %v1750_v14, %v958_v16  ;;  %v3189_v14 = vld [vmem:[#allocation15_spill] sm:$0xff] }
 0x2eb   :  { %v967_v12 = vsel %vm964_vm0, %v966_v22, %v962_v13  ;;  %v3201_v16 = vld [vmem:[#allocation27_spill] sm:$0xff]  ;;  %v3205_v22 = vld [vmem:[#allocation32_spill] sm:$0xff] }
 0x2ec   :  { %v3204_v13 = vld [vmem:[#allocation31_spill] sm:$0xff] }
 0x2f0   :  { %v1754_v26 = vpop.eup %1753 }
 0x2f1   :  { %v973_v30 = vmul.f32 %v1754_v26, %v967_v12  ;;  %v3206_v26 = vld [vmem:[#allocation33_spill] sm:$0xff]  ;;  %v3207_v12 = vld [vmem:[#allocation34_spill] sm:$0xff] }
 0x2f3   :  { %975 = vst [vmem:[#allocation8 + $0x18] sm:$0xff] %v973_v30  ;;  %999 = vmatmul.f32.vlgmr.msrb.gmra.mxu0 %v973_v30  ;;  %1019 = vmatmul.f32.vlgmr.msrb.gmra.mxu1 %v973_v30 }
 0x2f4   :  { %1039 = vmatmul.f32.vlgmr.msrb.gmra.mxu2 %v973_v30  ;;  %1059 = vmatmul.f32.vlgmr.msrb.gmra.mxu3 %v973_v30  ;;  %v3208_v30 = vld [vmem:[#allocation35_spill] sm:$0xff] }
 0x2f5   :  { %1295 = vmatpush.msrb.mxu0 %v2520_v47  ;;  %1315 = vmatpush.msrb.mxu1 %v2523_v37 }
 0x2f6   :  { %1335 = vmatpush.msrb.mxu2 %v2526_v38  ;;  %1355 = vmatpush.msrb.mxu3 %v2529_v39 }
 0x2f7   :  { %1296 = vmatpush.msrb.mxu0 %v2532_v40  ;;  %1316 = vmatpush.msrb.mxu1 %v2535_v41 }
 0x2f8   :  { %1336 = vmatpush.msrb.mxu2 %v2538_v42  ;;  %1356 = vmatpush.msrb.mxu3 %v2541_v43 }
 0x2f9   :  { %1297 = vmatpush.msrb.mxu0 %v2544_v44  ;;  %1317 = vmatpush.msrb.mxu1 %v2547_v45 }
 0x2fa   :  { %1337 = vmatpush.msrb.mxu2 %v2550_v46  ;;  %1357 = vmatpush.msrb.mxu3 %v2553_v48 }
 0x2fb   :  { %1298 = vmatpush.msrb.mxu0 %v2556_v49  ;;  %1318 = vmatpush.msrb.mxu1 %v2559_v50 }
 0x2fc   :  { %1338 = vmatpush.msrb.mxu2 %v2562_v51  ;;  %1358 = vmatpush.msrb.mxu3 %v2565_v55 }
 0x2fd   :  { %1299 = vmatpush.msrb.mxu0 %v2568_v63  ;;  %1319 = vmatpush.msrb.mxu1 %v2571_v54 }
 0x2fe   :  { %1339 = vmatpush.msrb.mxu2 %v2574_v6  ;;  %1359 = vmatpush.msrb.mxu3 %v2577_v20 }
 0x2ff   :  { %1300 = vmatpush.msrb.mxu0 %v2580_v1  ;;  %1320 = vmatpush.msrb.mxu1 %v2583_v60 }
 0x300   :  { %1340 = vmatpush.msrb.mxu2 %v2586_v58  ;;  %1360 = vmatpush.msrb.mxu3 %v2589_v8 }
 0x301   :  { %1301 = vmatpush.msrb.mxu0 %v2592_v57  ;;  %1321 = vmatpush.msrb.mxu1 %v2595_v52 }
 0x302   :  { %1341 = vmatpush.msrb.mxu2 %v2598_v53  ;;  %1361 = vmatpush.msrb.mxu3 %v2601_v7 }
 0x303   :  { %1302 = vmatpush.msrb.mxu0 %v2604_v59  ;;  %1322 = vmatpush.msrb.mxu1 %v2607_v34 }
 0x304   :  { %1342 = vmatpush.msrb.mxu2 %v2610_v61  ;;  %1362 = vmatpush.msrb.mxu3 %v2613_v56 }
 0x305   :  { %1303 = vmatpush.msrb.mxu0 %v2616_v0  ;;  %1323 = vmatpush.msrb.mxu1 %v2619_v5 }
 0x306   :  { %1343 = vmatpush.msrb.mxu2 %v2622_v62  ;;  %1363 = vmatpush.msrb.mxu3 %v2625_v3 }
 0x307   :  { %1304 = vmatpush.msrb.mxu0 %v2628_v2  ;;  %1324 = vmatpush.msrb.mxu1 %v2631_v4 }
 0x308   :  { %1344 = vmatpush.msrb.mxu2 %v3184_v17  ;;  %1364 = vmatpush.msrb.mxu3 %v3185_v21 }
 0x309   :  { %1305 = vmatpush.msrb.mxu0 %v3186_v9  ;;  %1325 = vmatpush.msrb.mxu1 %v3187_v10 }
 0x30a   :  { %1345 = vmatpush.msrb.mxu2 %v3188_v11  ;;  %1365 = vmatpush.msrb.mxu3 %v3189_v14 }
 0x30b   :  { %1306 = vmatpush.msrb.mxu0 %v3190_v35  ;;  %1326 = vmatpush.msrb.mxu1 %v3191_v23 }
 0x30c   :  { %1346 = vmatpush.msrb.mxu2 %v3192_v33  ;;  %1366 = vmatpush.msrb.mxu3 %v3193_v28 }
 0x30d   :  { %1307 = vmatpush.msrb.mxu0 %v3194_v18  ;;  %1327 = vmatpush.msrb.mxu1 %v3195_v29 }
 0x30e   :  { %1347 = vmatpush.msrb.mxu2 %v3196_v32  ;;  %1367 = vmatpush.msrb.mxu3 %v3197_v19  ;;  %v3210_v19 = vld [vmem:[#allocation49_spill] sm:$0xff]  ;;  %v3211_v32 = vld [vmem:[#allocation50_spill] sm:$0xff] }
 0x30f   :  { %1308 = vmatpush.msrb.mxu0 %v3198_v15  ;;  %1328 = vmatpush.msrb.mxu1 %v3199_v27  ;;  %v3209_v15 = vld [vmem:[#allocation36_spill] sm:$0xff] }
 0x310   :  { %1348 = vmatpush.msrb.mxu2 %v3200_v25  ;;  %1368 = vmatpush.msrb.mxu3 %v3201_v16 }
 0x311   :  { %1309 = vmatpush.msrb.mxu0 %v3202_v24  ;;  %1329 = vmatpush.msrb.mxu1 %v3203_v31 }
 0x312   :  { %1349 = vmatpush.msrb.mxu2 %v3204_v13  ;;  %1369 = vmatpush.msrb.mxu3 %v3205_v22  ;;  %v3212_v22 = vld [vmem:[#allocation52_spill] sm:$0xff] }
 0x313   :  { %1310 = vmatpush.msrb.mxu0 %v3206_v26  ;;  %1330 = vmatpush.msrb.mxu1 %v3207_v12 }
 0x314   :  { %1350 = vmatpush.msrb.mxu2 %v3208_v30  ;;  %1370 = vmatpush.msrb.mxu3 %v3209_v15 }
 0x370   :  { %v1000_v27 = vpop.f32.mrf.mxu0  ;;  %v1020_v25 = vpop.f32.mrf.mxu1 }
 0x371   :  { %v1063_v16 = vadd.f32 %v1000_v27, %v3210_v19  ;;  %v1064_v24 = vadd.f32 %v1020_v25, %v3211_v32  ;;  %v3213_v32 = vld [vmem:[#allocation51_spill] sm:$0xff] }
 0x373   :  { %v1672_v29 = vmul.f32 -1.442695, %v1063_v16  ;;  %v1673_v31 = vmul.f32 -1.442695, %v1064_v24 }
 0x375   :  { %1755 = vpow2.f32 %v1672_v29 }
 0x376   :  { %1757 = vpow2.f32 %v1673_v31 }
 0x377   :  { %v1060_v13 = vpop.f32.mrf.mxu3  ;;  %v1040_v15 = vpop.f32.mrf.mxu2 }
 0x378   :  { %v1066_v18 = vadd.f32 %v1060_v13, %v3212_v22  ;;  %v1065_v25 = vadd.f32 %v1040_v15, %v3213_v32 }
 0x37a   :  { %v1674_v26 = vmul.f32 -1.442695, %v1066_v18 }
 0x37b   :  { %v1756_v28 = vpop.eup %1755 }
 0x37c   :  { %v1758_v12 = vpop.eup %1757  ;;  %v1070_v33 = vadd.f32 1.0, %v1756_v28  ;;  %1759 = vpow2.f32 %v1674_v26 }
 0x37d   :  { %v1089_v30 = vadd.f32 1.0, %v1758_v12 }
 0x37e   :  { %1761 = vrcp.f32 %v1070_v33  ;;  %v1082_v18 = vand.u32 2147483648, %v1070_v33  ;;  %v1080_v26 = vand.u32 2147483647, %v1070_v33  ;;  %vm1076_vm3 = vweird.f32 %v1070_v33 }
 0x37f   :  { %1763 = vrcp.f32 %v1089_v30  ;;  %v1101_v22 = vand.u32 2147483648, %v1089_v30  ;;  %v1099_v35 = vand.u32 2147483647, %v1089_v30  ;;  %vm1095_vm4 = vweird.f32 %v1089_v30 }
 0x380   :  { %v1083_v15 = vor.u32 1.1754944e-38, %v1082_v18  ;;  %vm1081_vm7 = vcmp.eq.f32.partialorder %v1080_v26, 8.507059e+37 }
 0x381   :  { %vm1100_vm8 = vcmp.eq.f32.partialorder %v1099_v35, 8.507059e+37 }
 0x382   :  { %v1760_v23 = vpop.eup %1759 }
 0x383   :  { %v1109_v19 = vadd.f32 1.0, %v1760_v23 }
 0x384   :  { %v1762_v27 = vpop.eup %1761 }
 0x385   :  { %v1764_v16 = vpop.eup %1763  ;;  %v1072_v29 = vmul.f32 %v1762_v27, %v1070_v33  ;;  %1765 = vrcp.f32 %v1109_v19  ;;  %vm1077_vm1 = vweird.f32 %v1762_v27  ;;  %v1121_v18 = vand.u32 2147483648, %v1109_v19 }
 0x386   :  { %v1091_v24 = vmul.f32 %v1764_v16, %v1089_v30  ;;  %1767 = vtanh.f32 %v1065_v25  ;;  %vm1096_vm2 = vweird.f32 %v1764_v16  ;;  %vm1078_vm5 = vmor %vm1076_vm3, %vm1077_vm1  ;;  %vm1115_vm10 = vweird.f32 %v1109_v19 }
 0x387   :  { %v1073_v31 = vsub.f32 1.0, %v1072_v29  ;;  %vm1097_vm6 = vmor %vm1095_vm4, %vm1096_vm2  ;;  %v1102_v29 = vor.u32 1.1754944e-38, %v1101_v22  ;;  %v1122_v26 = vor.u32 1.1754944e-38, %v1121_v18 }
 0x388   :  { %v1092_v13 = vsub.f32 1.0, %v1091_v24 }
 0x389   :  { %v1074_v28 = vmul.f32 %v1762_v27, %v1073_v31 }
 0x38a   :  { %v1093_v12 = vmul.f32 %v1764_v16, %v1092_v13 }
 0x38b   :  { %v1766_v14 = vpop.eup %1765  ;;  %v1075_v23 = vadd.f32 %v1762_v27, %v1074_v28 }
 0x38c   :  { %v1094_v32 = vadd.f32 %v1764_v16, %v1093_v12  ;;  %v1111_v11 = vmul.f32 %v1766_v14, %v1109_v19  ;;  %v1768_v25 = vpop.eup %1767  ;;  %vm1116_vm9 = vweird.f32 %v1766_v14 }
 0x38d   :  { %v1079_v24 = vsel %vm1078_vm5, %v1762_v27, %v1075_v23  ;;  %v1119_v27 = vand.u32 2147483647, %v1109_v19  ;;  %vm1117_vm11 = vmor %vm1115_vm10, %vm1116_vm9  ;;  %v3243_v23 = vld [vmem:[#allocation55_spill] sm:$0xff] }
 0x38e   :  { %v1084_v10 = vsel %vm1081_vm7, %v1083_v15, %v1079_v24  ;;  %v1098_v31 = vsel %vm1097_vm6, %v1764_v16, %v1094_v32  ;;  %v1112_v9 = vsub.f32 1.0, %v1111_v11 }
 0x38f   :  { %v1103_v13 = vsel %vm1100_vm8, %v1102_v29, %v1098_v31  ;;  %v1126_v21 = vmul.f32 %v1768_v25, %v1084_v10  ;;  %vm1120_vm12 = vcmp.eq.f32.partialorder %v1119_v27, 8.507059e+37 }
 0x390   :  { %v1125_v17 = vmul.f32 %v1103_v13, %v2789_v36  ;;  %v1113_v28 = vmul.f32 %v1766_v14, %v1112_v9 }
 0x392   :  { %v2861_v33 = vadd.f32 %v1126_v21, %v1125_v17  ;;  %v1114_v30 = vadd.f32 %v1766_v14, %v1113_v28 }
 0x394   :  { %1769 = vtanh.f32 %v2861_v33  ;;  %v1118_v22 = vsel %vm1117_vm11, %v1766_v14, %v1114_v30 }
 0x395   :  { %v1123_v11 = vsel %vm1120_vm12, %v1122_v26, %v1118_v22 }
 0x39a   :  { %v1770_v35 = vpop.eup %1769 }
 0x39b   :  { %v1129_v16 = vmul.f32 %v1770_v35, %v1123_v11 }
 0x39d   :  { %1131 = vst [vmem:[#allocation8 + $0x20] sm:$0xff] %v1129_v16  ;;  %1155 = vmatmul.f32.vlgmr.msra.gmra.mxu0 %v1129_v16  ;;  %1175 = vmatmul.f32.vlgmr.msra.gmra.mxu1 %v1129_v16 }
 0x39e   :  { %1195 = vmatmul.f32.vlgmr.msra.gmra.mxu2 %v1129_v16  ;;  %1215 = vmatmul.f32.vlgmr.msra.gmra.mxu3 %v1129_v16 }
 0x39f   :  { %1451 = vmatpush.msra.mxu0 %v2520_v47  ;;  %1471 = vmatpush.msra.mxu1 %v2523_v37  ;;  %v3214_v47 = vld [vmem:[#allocation12_spill] sm:$0xff]  ;;  %v3215_v37 = vld [vmem:[#allocation11_spill] sm:$0xff] }
 0x3a0   :  { %1491 = vmatpush.msra.mxu2 %v2526_v38  ;;  %1511 = vmatpush.msra.mxu3 %v2529_v39  ;;  %v3216_v38 = vld [vmem:[#allocation13_spill] sm:$0xff]  ;;  %v3217_v39 = vld [vmem:[#allocation14_spill] sm:$0xff] }
 0x3a1   :  { %1452 = vmatpush.msra.mxu0 %v2532_v40  ;;  %1472 = vmatpush.msra.mxu1 %v2535_v41  ;;  %v3218_v40 = vld [vmem:[#allocation16_spill] sm:$0xff]  ;;  %v3219_v41 = vld [vmem:[#allocation15_spill] sm:$0xff] }
 0x3a2   :  { %1492 = vmatpush.msra.mxu2 %v2538_v42  ;;  %1512 = vmatpush.msra.mxu3 %v2541_v43  ;;  %v3220_v42 = vld [vmem:[#allocation17_spill] sm:$0xff]  ;;  %v3221_v43 = vld [vmem:[#allocation18_spill] sm:$0xff] }
 0x3a3   :  { %1453 = vmatpush.msra.mxu0 %v2544_v44  ;;  %1473 = vmatpush.msra.mxu1 %v2547_v45  ;;  %v3222_v44 = vld [vmem:[#allocation20_spill] sm:$0xff]  ;;  %v3223_v45 = vld [vmem:[#allocation19_spill] sm:$0xff] }
 0x3a4   :  { %1493 = vmatpush.msra.mxu2 %v2550_v46  ;;  %1513 = vmatpush.msra.mxu3 %v2553_v48  ;;  %v3224_v46 = vld [vmem:[#allocation21_spill] sm:$0xff]  ;;  %v3225_v48 = vld [vmem:[#allocation22_spill] sm:$0xff] }
 0x3a5   :  { %1454 = vmatpush.msra.mxu0 %v2556_v49  ;;  %1474 = vmatpush.msra.mxu1 %v2559_v50  ;;  %v3226_v49 = vld [vmem:[#allocation24_spill] sm:$0xff]  ;;  %v3227_v50 = vld [vmem:[#allocation23_spill] sm:$0xff] }
 0x3a6   :  { %1494 = vmatpush.msra.mxu2 %v2562_v51  ;;  %1514 = vmatpush.msra.mxu3 %v2565_v55  ;;  %v3228_v51 = vld [vmem:[#allocation25_spill] sm:$0xff]  ;;  %v3229_v55 = vld [vmem:[#allocation26_spill] sm:$0xff] }
 0x3a7   :  { %1455 = vmatpush.msra.mxu0 %v2568_v63  ;;  %1475 = vmatpush.msra.mxu1 %v2571_v54  ;;  %v3230_v63 = vld [vmem:[#allocation28_spill] sm:$0xff]  ;;  %v3231_v54 = vld [vmem:[#allocation27_spill] sm:$0xff] }
 0x3a8   :  { %1495 = vmatpush.msra.mxu2 %v2574_v6  ;;  %1515 = vmatpush.msra.mxu3 %v2577_v20  ;;  %v3232_v6 = vld [vmem:[#allocation29_spill] sm:$0xff]  ;;  %v3233_v20 = vld [vmem:[#allocation30_spill] sm:$0xff] }
 0x3a9   :  { %1456 = vmatpush.msra.mxu0 %v2580_v1  ;;  %1476 = vmatpush.msra.mxu1 %v2583_v60  ;;  %v3234_v1 = vld [vmem:[#allocation31_spill] sm:$0xff]  ;;  %v3235_v60 = vld [vmem:[#allocation32_spill] sm:$0xff] }
 0x3aa   :  { %1496 = vmatpush.msra.mxu2 %v2586_v58  ;;  %1516 = vmatpush.msra.mxu3 %v2589_v8  ;;  %v3236_v58 = vld [vmem:[#allocation33_spill] sm:$0xff]  ;;  %v3237_v8 = vld [vmem:[#allocation34_spill] sm:$0xff] }
 0x3ab   :  { %1457 = vmatpush.msra.mxu0 %v2592_v57  ;;  %1477 = vmatpush.msra.mxu1 %v2595_v52  ;;  %v3238_v57 = vld [vmem:[#allocation35_spill] sm:$0xff]  ;;  %v3239_v52 = vld [vmem:[#allocation36_spill] sm:$0xff] }
 0x3ac   :  { %1497 = vmatpush.msra.mxu2 %v2598_v53  ;;  %1517 = vmatpush.msra.mxu3 %v2601_v7 }
 0x3ad   :  { %1458 = vmatpush.msra.mxu0 %v2604_v59  ;;  %1478 = vmatpush.msra.mxu1 %v2607_v34  ;;  %v3240_v59 = vld [vmem:[#allocation53_spill] sm:$0xff] }
 0x3ae   :  { %1498 = vmatpush.msra.mxu2 %v2610_v61  ;;  %1518 = vmatpush.msra.mxu3 %v2613_v56  ;;  %v3241_v61 = vld [vmem:[#allocation54_spill] sm:$0xff] }
 0x3af   :  { %1459 = vmatpush.msra.mxu0 %v2616_v0  ;;  %1479 = vmatpush.msra.mxu1 %v2619_v5 }
 0x3b0   :  { %1499 = vmatpush.msra.mxu2 %v2622_v62  ;;  %1519 = vmatpush.msra.mxu3 %v2625_v3  ;;  %v3242_v3 = vld [vmem:[#allocation56_spill] sm:$0xff] }
 0x3b1   :  { %1460 = vmatpush.msra.mxu0 %v2628_v2  ;;  %1480 = vmatpush.msra.mxu1 %v2631_v4 }
 0x3b2   :  { %1500 = vmatpush.msra.mxu2 %v3214_v47  ;;  %1520 = vmatpush.msra.mxu3 %v3215_v37 }
 0x3b3   :  { %1461 = vmatpush.msra.mxu0 %v3216_v38  ;;  %1481 = vmatpush.msra.mxu1 %v3217_v39 }
 0x3b4   :  { %1501 = vmatpush.msra.mxu2 %v3218_v40  ;;  %1521 = vmatpush.msra.mxu3 %v3219_v41 }
 0x3b5   :  { %1462 = vmatpush.msra.mxu0 %v3220_v42  ;;  %1482 = vmatpush.msra.mxu1 %v3221_v43 }
 0x3b6   :  { %1502 = vmatpush.msra.mxu2 %v3222_v44  ;;  %1522 = vmatpush.msra.mxu3 %v3223_v45 }
 0x3b7   :  { %1463 = vmatpush.msra.mxu0 %v3224_v46  ;;  %1483 = vmatpush.msra.mxu1 %v3225_v48 }
 0x3b8   :  { %1503 = vmatpush.msra.mxu2 %v3226_v49  ;;  %1523 = vmatpush.msra.mxu3 %v3227_v50 }
 0x3b9   :  { %1464 = vmatpush.msra.mxu0 %v3228_v51  ;;  %1484 = vmatpush.msra.mxu1 %v3229_v55 }
 0x3ba   :  { %1504 = vmatpush.msra.mxu2 %v3230_v63  ;;  %1524 = vmatpush.msra.mxu3 %v3231_v54 }
 0x3bb   :  { %1465 = vmatpush.msra.mxu0 %v3232_v6  ;;  %1485 = vmatpush.msra.mxu1 %v3233_v20 }
 0x3bc   :  { %1505 = vmatpush.msra.mxu2 %v3234_v1  ;;  %1525 = vmatpush.msra.mxu3 %v3235_v60  ;;  %v3244_v60 = vld [vmem:[#allocation57_spill] sm:$0xff] }
 0x3bd   :  { %1466 = vmatpush.msra.mxu0 %v3236_v58  ;;  %1486 = vmatpush.msra.mxu1 %v3237_v8  ;;  %v3245_v8 = vld [vmem:[#allocation58_spill] sm:$0xff] }
 0x3be   :  { %1506 = vmatpush.msra.mxu2 %v3238_v57  ;;  %1526 = vmatpush.msra.mxu3 %v3239_v52 }
 0x41a   :  { %v1156_v53 = vpop.f32.mrf.mxu0  ;;  %v1176_v7 = vpop.f32.mrf.mxu1 }
 0x41b   :  { %v1219_v34 = vadd.f32 %v1156_v53, %v3240_v59  ;;  %v1220_v56 = vadd.f32 %v1176_v7, %v3241_v61  ;;  %v3246_v59 = vld [vmem:[#allocation60_spill] sm:$0xff] }
 0x41d   :  { %v1675_v0 = vmul.f32 -1.442695, %v1219_v34  ;;  %v1676_v5 = vmul.f32 -1.442695, %v1220_v56 }
 0x41f   :  { %1771 = vpow2.f32 %v1675_v0 }
 0x420   :  { %1773 = vpow2.f32 %v1676_v5 }
 0x421   :  { %v1216_v62 = vpop.f32.mrf.mxu3  ;;  %v1196_v10 = vpop.f32.mrf.mxu2 }
 0x422   :  { %v1222_v2 = vadd.f32 %v1216_v62, %v3242_v3  ;;  %v1221_v15 = vadd.f32 %v1196_v10, %v3243_v23 }
 0x424   :  { %v1677_v4 = vmul.f32 -1.442695, %v1222_v2 }
 0x425   :  { %v1772_v36 = vpop.eup %1771 }
 0x426   :  { %v1774_v17 = vpop.eup %1773  ;;  %v1226_v21 = vadd.f32 1.0, %v1772_v36  ;;  %1775 = vpow2.f32 %v1677_v4 }
 0x427   :  { %v1245_v9 = vadd.f32 1.0, %v1774_v17  ;;  %v3247_v17 = vld [vmem:[#allocation59_spill] sm:$0xff] }
 0x428   :  { %1777 = vrcp.f32 %v1226_v21  ;;  %v1238_v13 = vand.u32 2147483648, %v1226_v21  ;;  %v1236_v18 = vand.u32 2147483647, %v1226_v21  ;;  %vm1232_vm15 = vweird.f32 %v1226_v21 }
 0x429   :  { %1779 = vrcp.f32 %v1245_v9  ;;  %v1257_v28 = vand.u32 2147483648, %v1245_v9  ;;  %v1255_v22 = vand.u32 2147483647, %v1245_v9  ;;  %vm1251_vm0 = vweird.f32 %v1245_v9 }
 0x42a   :  { %v1239_v11 = vor.u32 1.1754944e-38, %v1238_v13  ;;  %vm1237_vm3 = vcmp.eq.f32.partialorder %v1236_v18, 8.507059e+37 }
 0x42b   :  { %v1258_v37 = vor.u32 1.1754944e-38, %v1257_v28  ;;  %vm1256_vm4 = vcmp.eq.f32.partialorder %v1255_v22, 8.507059e+37 }
 0x42c   :  { %v1776_v14 = vpop.eup %1775 }
 0x42d   :  { %v1265_v19 = vadd.f32 1.0, %v1776_v14 }
 0x42e   :  { %v1778_v12 = vpop.eup %1777 }
 0x42f   :  { %v1780_v32 = vpop.eup %1779  ;;  %v1228_v29 = vmul.f32 %v1778_v12, %v1226_v21  ;;  %1781 = vrcp.f32 %v1265_v19  ;;  %vm1233_vm13 = vweird.f32 %v1778_v12  ;;  %v1277_v50 = vand.u32 2147483648, %v1265_v19 }
 0x430   :  { %v1247_v24 = vmul.f32 %v1780_v32, %v1245_v9  ;;  %1783 = vtanh.f32 %v1221_v15  ;;  %vm1252_vm14 = vweird.f32 %v1780_v32  ;;  %vm1234_vm1 = vmor %vm1232_vm15, %vm1233_vm13  ;;  %vm1271_vm6 = vweird.f32 %v1265_v19 }
 0x431   :  { %v1229_v25 = vsub.f32 1.0, %v1228_v29  ;;  %vm1253_vm2 = vmor %vm1251_vm0, %vm1252_vm14  ;;  %v1275_v51 = vand.u32 2147483647, %v1265_v19  ;;  %v1278_v63 = vor.u32 1.1754944e-38, %v1277_v50 }
 0x432   :  { %v1248_v31 = vsub.f32 1.0, %v1247_v24 }
 0x433   :  { %v1230_v30 = vmul.f32 %v1778_v12, %v1229_v25  ;;  %vm1276_vm8 = vcmp.eq.f32.partialorder %v1275_v51, 8.507059e+37 }
 0x434   :  { %v1249_v27 = vmul.f32 %v1780_v32, %v1248_v31 }
 0x435   :  { %v1782_v26 = vpop.eup %1781  ;;  %v1231_v35 = vadd.f32 %v1778_v12, %v1230_v30 }
 0x436   :  { %v1250_v16 = vadd.f32 %v1780_v32, %v1249_v27  ;;  %v1267_v47 = vmul.f32 %v1782_v26, %v1265_v19  ;;  %v1784_v39 = vpop.eup %1783  ;;  %vm1272_vm5 = vweird.f32 %v1782_v26 }
 0x437   :  { %v1235_v38 = vsel %vm1234_vm1, %v1778_v12, %v1231_v35  ;;  %vm1273_vm7 = vmor %vm1271_vm6, %vm1272_vm5 }
 0x438   :  { %v1240_v40 = vsel %vm1237_vm3, %v1239_v11, %v1235_v38  ;;  %v1254_v41 = vsel %vm1253_vm2, %v1780_v32, %v1250_v16  ;;  %v1268_v42 = vsub.f32 1.0, %v1267_v47 }
 0x439   :  { %v1259_v43 = vsel %vm1256_vm4, %v1258_v37, %v1254_v41  ;;  %v1282_v44 = vmul.f32 %v1784_v39, %v1240_v40 }
 0x43a   :  { %v1281_v45 = vmul.f32 %v1259_v43, %v2861_v33  ;;  %v1269_v46 = vmul.f32 %v1782_v26, %v1268_v42 }
 0x43c   :  { %v2933_v48 = vadd.f32 %v1282_v44, %v1281_v45  ;;  %v1270_v49 = vadd.f32 %v1782_v26, %v1269_v46 }
 0x43e   :  { %1785 = vtanh.f32 %v2933_v48  ;;  %v1274_v55 = vsel %vm1273_vm7, %v1782_v26, %v1270_v49 }
 0x43f   :  { %v1279_v6 = vsel %vm1276_vm8, %v1278_v63, %v1274_v55  ;;  %v3248_v55 = vld [vmem:[#allocation61_spill] sm:$0xff] }
 0x444   :  { %v1786_v54 = vpop.eup %1785 }
 0x445   :  { %v1285_v20 = vmul.f32 %v1786_v54, %v1279_v6  ;;  %v3249_v54 = vld [vmem:[#allocation62_spill] sm:$0xff] }
 0x447   :  { %1287 = vst [vmem:[#allocation8 + $0x28] sm:$0xff] %v1285_v20  ;;  %1311 = vmatmul.f32.vlgmr.msrb.gmra.mxu0 %v1285_v20  ;;  %1331 = vmatmul.f32.vlgmr.msrb.gmra.mxu1 %v1285_v20 }
 0x448   :  { %1351 = vmatmul.f32.vlgmr.msrb.gmra.mxu2 %v1285_v20  ;;  %1371 = vmatmul.f32.vlgmr.msrb.gmra.mxu3 %v1285_v20 }
 0x4c4   :  { %v1312_v33 = vpop.f32.mrf.mxu0  ;;  %v1332_v1 = vpop.f32.mrf.mxu1 }
 0x4c5   :  { %v1375_v58 = vadd.f32 %v1312_v33, %v3244_v60  ;;  %v1376_v57 = vadd.f32 %v1332_v1, %v3245_v8  ;;  %v3250_v60 = vld [vmem:[#allocation64_spill] sm:$0xff] }
 0x4c7   :  { %v1678_v52 = vmul.f32 -1.442695, %v1375_v58  ;;  %v1679_v53 = vmul.f32 -1.442695, %v1376_v57 }
 0x4c9   :  { %1787 = vpow2.f32 %v1678_v52 }
 0x4ca   :  { %1789 = vpow2.f32 %v1679_v53 }
 0x4cb   :  { %v1372_v7 = vpop.f32.mrf.mxu3  ;;  %v1352_v3 = vpop.f32.mrf.mxu2 }
 0x4cc   :  { %v1378_v34 = vadd.f32 %v1372_v7, %v3246_v59  ;;  %v1377_v21 = vadd.f32 %v1352_v3, %v3247_v17 }
 0x4ce   :  { %v1680_v61 = vmul.f32 -1.442695, %v1378_v34 }
 0x4cf   :  { %v1788_v56 = vpop.eup %1787 }
 0x4d0   :  { %v1790_v0 = vpop.eup %1789  ;;  %v1382_v5 = vadd.f32 1.0, %v1788_v56  ;;  %1791 = vpow2.f32 %v1680_v61 }
 0x4d1   :  { %v1401_v62 = vadd.f32 1.0, %v1790_v0  ;;  %v3251_v0 = vld [vmem:[#allocation63_spill] sm:$0xff] }
 0x4d2   :  { %1793 = vrcp.f32 %v1382_v5  ;;  %v1394_v23 = vand.u32 2147483648, %v1382_v5  ;;  %v1392_v29 = vand.u32 2147483647, %v1382_v5  ;;  %vm1388_vm11 = vweird.f32 %v1382_v5 }
 0x4d3   :  { %1795 = vrcp.f32 %v1401_v62  ;;  %v1413_v15 = vand.u32 2147483648, %v1401_v62  ;;  %v1411_v25 = vand.u32 2147483647, %v1401_v62  ;;  %vm1407_vm12 = vweird.f32 %v1401_v62 }
 0x4d4   :  { %v1395_v28 = vor.u32 1.1754944e-38, %v1394_v23  ;;  %vm1393_vm15 = vcmp.eq.f32.partialorder %v1392_v29, 8.507059e+37 }
 0x4d5   :  { %v1414_v27 = vor.u32 1.1754944e-38, %v1413_v15  ;;  %vm1412_vm0 = vcmp.eq.f32.partialorder %v1411_v25, 8.507059e+37 }
 0x4d6   :  { %v1792_v2 = vpop.eup %1791 }
 0x4d7   :  { %v1421_v4 = vadd.f32 1.0, %v1792_v2 }
 0x4d8   :  { %v1794_v36 = vpop.eup %1793 }
 0x4d9   :  { %v1796_v9 = vpop.eup %1795  ;;  %v1384_v10 = vmul.f32 %v1794_v36, %v1382_v5  ;;  %1797 = vrcp.f32 %v1421_v4  ;;  %vm1389_vm9 = vweird.f32 %v1794_v36  ;;  %v1433_v42 = vand.u32 2147483648, %v1421_v4 }
 0x4da   :  { %v1403_v14 = vmul.f32 %v1796_v9, %v1401_v62  ;;  %1799 = vtanh.f32 %v1377_v21  ;;  %vm1408_vm10 = vweird.f32 %v1796_v9  ;;  %vm1390_vm13 = vmor %vm1388_vm11, %vm1389_vm9  ;;  %vm1427_vm2 = vweird.f32 %v1421_v4 }
 0x4db   :  { %v1385_v19 = vsub.f32 1.0, %v1384_v10  ;;  %vm1409_vm14 = vmor %vm1407_vm12, %vm1408_vm10  ;;  %v1431_v43 = vand.u32 2147483647, %v1421_v4  ;;  %v1434_v45 = vor.u32 1.1754944e-38, %v1433_v42 }
 0x4dc   :  { %v1404_v12 = vsub.f32 1.0, %v1403_v14 }
 0x4dd   :  { %v1386_v32 = vmul.f32 %v1794_v36, %v1385_v19  ;;  %vm1432_vm4 = vcmp.eq.f32.partialorder %v1431_v43, 8.507059e+37 }
 0x4de   :  { %v1405_v24 = vmul.f32 %v1796_v9, %v1404_v12 }
 0x4df   :  { %v1798_v31 = vpop.eup %1797  ;;  %v1387_v13 = vadd.f32 %v1794_v36, %v1386_v32 }
 0x4e0   :  { %v1406_v30 = vadd.f32 %v1796_v9, %v1405_v24  ;;  %v1423_v18 = vmul.f32 %v1798_v31, %v1421_v4  ;;  %v1800_v26 = vpop.eup %1799  ;;  %vm1428_vm1 = vweird.f32 %v1798_v31 }
 0x4e1   :  { %v1391_v22 = vsel %vm1390_vm13, %v1794_v36, %v1387_v13  ;;  %vm1429_vm3 = vmor %vm1427_vm2, %vm1428_vm1 }
 0x4e2   :  { %v1396_v35 = vsel %vm1393_vm15, %v1395_v28, %v1391_v22  ;;  %v1410_v11 = vsel %vm1409_vm14, %v1796_v9, %v1406_v30  ;;  %v1424_v16 = vsub.f32 1.0, %v1423_v18 }
 0x4e3   :  { %v1415_v47 = vsel %vm1412_vm0, %v1414_v27, %v1410_v11  ;;  %v1438_v37 = vmul.f32 %v1800_v26, %v1396_v35 }
 0x4e4   :  { %v1437_v38 = vmul.f32 %v1415_v47, %v2933_v48  ;;  %v1425_v39 = vmul.f32 %v1798_v31, %v1424_v16 }
 0x4e6   :  { %v2941_v40 = vadd.f32 %v1438_v37, %v1437_v38  ;;  %v1426_v41 = vadd.f32 %v1798_v31, %v1425_v39 }
 0x4e8   :  { %1801 = vtanh.f32 %v2941_v40  ;;  %v1430_v44 = vsel %vm1429_vm3, %v1798_v31, %v1426_v41 }
 0x4e9   :  { %v1435_v49 = vsel %vm1432_vm4, %v1434_v45, %v1430_v44 }
 0x4ee   :  { %v1802_v46 = vpop.eup %1801 }
 0x4ef   :  { %v1441_v50 = vmul.f32 %v1802_v46, %v1435_v49 }
 0x4f1   :  { %1443 = vst [vmem:[#allocation8 + $0x30] sm:$0xff] %v1441_v50  ;;  %1467 = vmatmul.f32.vlgmr.msra.gmra.mxu0 %v1441_v50  ;;  %1487 = vmatmul.f32.vlgmr.msra.gmra.mxu1 %v1441_v50 }
 0x4f2   :  { %1507 = vmatmul.f32.vlgmr.msra.gmra.mxu2 %v1441_v50  ;;  %1527 = vmatmul.f32.vlgmr.msra.gmra.mxu3 %v1441_v50 }
 0x56e   :  { %v1468_v48 = vpop.f32.mrf.mxu0  ;;  %v1488_v51 = vpop.f32.mrf.mxu1 }
 0x56f   :  { %v1531_v63 = vadd.f32 %v1468_v48, %v3248_v55  ;;  %v1532_v6 = vadd.f32 %v1488_v51, %v3249_v54 }
 0x571   :  { %v1681_v20 = vmul.f32 -1.442695, %v1531_v63  ;;  %v1682_v33 = vmul.f32 -1.442695, %v1532_v6 }
 0x573   :  { %1803 = vpow2.f32 %v1681_v20 }
 0x574   :  { %1805 = vpow2.f32 %v1682_v33 }
 0x575   :  { %v1528_v1 = vpop.f32.mrf.mxu3  ;;  %v1508_v59 = vpop.f32.mrf.mxu2 }
 0x576   :  { %v1534_v58 = vadd.f32 %v1528_v1, %v3250_v60  ;;  %v1533_v5 = vadd.f32 %v1508_v59, %v3251_v0 }
 0x578   :  { %v1683_v8 = vmul.f32 -1.442695, %v1534_v58 }
 0x579   :  { %v1804_v57 = vpop.eup %1803 }
 0x57a   :  { %v1806_v52 = vpop.eup %1805  ;;  %v1538_v53 = vadd.f32 1.0, %v1804_v57  ;;  %1807 = vpow2.f32 %v1683_v8 }
 0x57b   :  { %v1557_v7 = vadd.f32 1.0, %v1806_v52 }
 0x57c   :  { %1809 = vrcp.f32 %v1538_v53  ;;  %v1550_v17 = vand.u32 2147483648, %v1538_v53  ;;  %v1548_v10 = vand.u32 2147483647, %v1538_v53  ;;  %vm1544_vm7 = vweird.f32 %v1538_v53 }
 0x57d   :  { %1811 = vrcp.f32 %v1557_v7  ;;  %v1569_v21 = vand.u32 2147483648, %v1557_v7  ;;  %v1567_v19 = vand.u32 2147483647, %v1557_v7  ;;  %vm1563_vm8 = vweird.f32 %v1557_v7 }
 0x57e   :  { %v1551_v15 = vor.u32 1.1754944e-38, %v1550_v17  ;;  %vm1549_vm11 = vcmp.eq.f32.partialorder %v1548_v10, 8.507059e+37 }
 0x57f   :  { %v1570_v24 = vor.u32 1.1754944e-38, %v1569_v21  ;;  %vm1568_vm12 = vcmp.eq.f32.partialorder %v1567_v19, 8.507059e+37 }
 0x580   :  { %v1808_v34 = vpop.eup %1807 }
 0x581   :  { %v1577_v61 = vadd.f32 1.0, %v1808_v34 }
 0x582   :  { %v1810_v56 = vpop.eup %1809 }
 0x583   :  { %v1812_v62 = vpop.eup %1811  ;;  %v1540_v3 = vmul.f32 %v1810_v56, %v1538_v53  ;;  %1813 = vrcp.f32 %v1577_v61  ;;  %vm1545_vm5 = vweird.f32 %v1810_v56  ;;  %v1589_v16 = vand.u32 2147483648, %v1577_v61 }
 0x584   :  { %v1559_v2 = vmul.f32 %v1812_v62, %v1557_v7  ;;  %1815 = vtanh.f32 %v1533_v5  ;;  %vm1564_vm6 = vweird.f32 %v1812_v62  ;;  %vm1546_vm9 = vmor %vm1544_vm7, %vm1545_vm5  ;;  %vm1583_vm14 = vweird.f32 %v1577_v61 }
 0x585   :  { %v1541_v4 = vsub.f32 1.0, %v1540_v3  ;;  %vm1565_vm10 = vmor %vm1563_vm8, %vm1564_vm6  ;;  %v1587_v47 = vand.u32 2147483647, %v1577_v61  ;;  %v1590_v38 = vor.u32 1.1754944e-38, %v1589_v16 }
 0x586   :  { %v1560_v36 = vsub.f32 1.0, %v1559_v2 }
 0x587   :  { %v1542_v9 = vmul.f32 %v1810_v56, %v1541_v4  ;;  %vm1588_vm0 = vcmp.eq.f32.partialorder %v1587_v47, 8.507059e+37 }
 0x588   :  { %v1561_v14 = vmul.f32 %v1812_v62, %v1560_v36 }
 0x589   :  { %v1814_v12 = vpop.eup %1813  ;;  %v1543_v23 = vadd.f32 %v1810_v56, %v1542_v9 }
 0x58a   :  { %v1562_v32 = vadd.f32 %v1812_v62, %v1561_v14  ;;  %v1579_v29 = vmul.f32 %v1814_v12, %v1577_v61  ;;  %v1816_v31 = vpop.eup %1815  ;;  %vm1584_vm13 = vweird.f32 %v1814_v12 }
 0x58b   :  { %v1547_v25 = vsel %vm1546_vm9, %v1810_v56, %v1543_v23  ;;  %vm1585_vm15 = vmor %vm1583_vm14, %vm1584_vm13 }
 0x58c   :  { %v1552_v13 = vsel %vm1549_vm11, %v1551_v15, %v1547_v25  ;;  %v1566_v28 = vsel %vm1565_vm10, %v1812_v62, %v1562_v32  ;;  %v1580_v30 = vsub.f32 1.0, %v1579_v29 }
 0x58d   :  { %v1571_v18 = vsel %vm1568_vm12, %v1570_v24, %v1566_v28  ;;  %v1594_v27 = vmul.f32 %v1816_v31, %v1552_v13 }
 0x58e   :  { %v1593_v22 = vmul.f32 %v1571_v18, %v2941_v40  ;;  %v1581_v26 = vmul.f32 %v1814_v12, %v1580_v30 }
 0x590   :  { %v1595_v35 = vadd.f32 %v1594_v27, %v1593_v22  ;;  %v1582_v11 = vadd.f32 %v1814_v12, %v1581_v26 }
 0x592   :  { %1817 = vtanh.f32 %v1595_v35  ;;  %v1586_v37 = vsel %vm1585_vm15, %v1814_v12, %v1582_v11 }
 0x593   :  { %v1591_v40 = vsel %vm1588_vm0, %v1590_v38, %v1586_v37 }
 0x598   :  { %v1818_v39 = vpop.eup %1817 }
 0x599   :  { %v1597_v41 = vmul.f32 %v1818_v39, %v1591_v40 }
 0x59b   :  { %1599 = vst [vmem:[#allocation8 + $0x38] sm:$0xff] %v1597_v41 }
 0x59c   :  { %1614 = dma.vmem_to_hbm [thread:$0]  %s1607_s27, 1024, %s1609_s29, [#allocation7], %s1940_s30, %s1940_s30, %s1941_s5  }
 0x59d   :  { %1933 = dma.done.wait [#allocation7], 1024  }
 0x59e   :  { %1934 = vsyncadd [#allocation7], 4294966272 }
 0x59f   :  { %1619 = vsyncpa [#allocation6], 1 }
 0x5a0   :  { %1620 = vsyncpa [#allocation7], 1 }

</bundles_post_ra>
